<compile_context>
chip_gen: v7x
topology: tpu7x:2x2x1
jax: 0.10.0
libtpu: 0.0.40
codegen_flags: <defaults>
</compile_context>

<pallas_src>
import functools

import jax
import jax.numpy as jnp
from jax import lax
from jax.experimental import pallas as pl
from jax.experimental.pallas import tpu as pltpu


def _linearlist_kernel(x_ref, w_ref, o_ref, wbd_ref, *, G, per_in, per_out):
    # x_ref   : (TB, G*per_in)        -- one batch tile of one group of G linears
    # w_ref   : (per_out, G*per_in)   -- packed weights of this group (resident)
    # o_ref   : (TB, G*per_out)       -- lane-dense output tile, written once
    # wbd_ref : (G*per_out, G*per_in) -- VMEM scratch: block-diagonal weight

    # Stage the block-diagonal weight once per group.  The batch axis is the
    # inner grid axis and runs sequentially ("arbitrary"), so program_id(1)==0
    # is the first step of every group on each core.
    @pl.when(pl.program_id(1) == 0)
    def _stage_weights():
        wbd_ref[...] = jnp.zeros_like(wbd_ref)
        for g in range(G):  # small static unroll, once per group
            wbd_ref[g * per_out:(g + 1) * per_out,
                    g * per_in:(g + 1) * per_in] = w_ref[:, g * per_in:(g + 1) * per_in]

    # One MXU matmul per grid step; the W^T is absorbed by the contraction
    # dims (no data movement), the block-diagonal structure routes each input
    # slab to its own output slab.  f32 accumulation.
    y = lax.dot_general(
        x_ref[...], wbd_ref[...],
        dimension_numbers=(((1,), (1,)), ((), ())),
        preferred_element_type=jnp.float32)
    o_ref[...] = y.astype(o_ref.dtype)


def _pick_group(num_linears, per_in, per_out, itemsize,
                target_lanes=512, scratch_budget=8 << 20):
    """Pick G (divisor of L) so G*per_in and G*per_out are 128-multiples.

    Prefer the smallest such G with G*per_in >= target_lanes (wide, lane-dense
    blocks but as many parallel groups as possible); otherwise the widest
    available.  The block-diagonal scratch (G^2*per_in*per_out) must fit a
    modest VMEM budget."""
    cands = [g for g in range(1, num_linears + 1)
             if num_linears % g == 0
             and (g * per_in) % 128 == 0
             and (g * per_out) % 128 == 0
             and g * g * per_in * per_out * itemsize <= scratch_budget]
    if not cands:
        # TODO(synk): pad per_out/per_in to the next 128 multiple instead of
        # falling back to full-extent (non-lane-dense) blocks.
        return num_linears
    wide = [g for g in cands if g * per_in >= target_lanes]
    return min(wide) if wide else max(cands)


def _pick_batch_tile(B, itemsize, block_b=None):
    """Largest batch tile <= target that divides B and respects sublane tiling
    (8 rows for f32, 16 for bf16).  Full-extent rows (TB=B) as fallback."""
    sub = max(8, 32 // itemsize)
    target = block_b if block_b is not None else 128
    t = (min(B, target) // sub) * sub
    while t >= sub:
        if B % t == 0:
            return t
        t -= sub
    return B


def linear_list_forward(x, weight, num_linears, *, block_b=None):
    """x: (B, num_linears*per_in), weight: (per_out, num_linears*per_in)."""
    B, in_features = x.shape
    per_out = weight.shape[0]
    assert weight.shape[1] % num_linears == 0, (
        "weight width must be num_linears * per_input_features")
    per_in = weight.shape[1] // num_linears
    assert in_features == num_linears * per_in, "x width must match weight width"
    assert x.dtype == weight.dtype, "x and weight must share a dtype"
    L = num_linears
    itemsize = jnp.dtype(x.dtype).itemsize

    G = _pick_group(L, per_in, per_out, itemsize)
    n_groups = L // G
    TB = _pick_batch_tile(B, itemsize, block_b)
    n_b = B // TB

    kernel = functools.partial(_linearlist_kernel, G=G, per_in=per_in, per_out=per_out)

    # Double-buffered block footprint + scratch; set an explicit scoped-VMEM
    # limit with headroom (safe for v7x's 64 MiB physical VMEM).
    x_blk = TB * G * per_in * itemsize
    w_blk = per_out * G * per_in * itemsize
    o_blk = TB * G * per_out * itemsize
    scratch_bytes = (G * per_out) * (G * per_in) * itemsize
    vmem_bytes = 2 * (x_blk + w_blk + o_blk) + scratch_bytes
    vmem_limit = int(min(max(2 * vmem_bytes, 32 << 20), 48 << 20))

    cost = pl.CostEstimate(
        flops=2 * B * L * per_in * per_out,
        transcendentals=0,
        bytes_accessed=(x.size + weight.size + B * L * per_out) * itemsize)

    return pl.pallas_call(
        kernel,
        out_shape=jax.ShapeDtypeStruct((B, L * per_out), x.dtype),
        grid_spec=pltpu.PrefetchScalarGridSpec(
            num_scalar_prefetch=0,
            # Group axis OUTER (weight block resident across batch tiles),
            # batch-tile axis INNER.
            grid=(n_groups, n_b),
            in_specs=[
                # Batch tile b of group gi: rows [b*TB, (b+1)*TB),
                # cols [gi*G*per_in, (gi+1)*G*per_in).
                pl.BlockSpec((TB, G * per_in), lambda gi, b: (b, gi)),
                # Packed weights of group gi (index constant in b -> no re-DMA).
                pl.BlockSpec((per_out, G * per_in), lambda gi, b: (0, gi)),
            ],
            # Lane-dense output tile (G*per_out is a 128 multiple).
            out_specs=pl.BlockSpec((TB, G * per_out), lambda gi, b: (b, gi)),
            scratch_shapes=[pltpu.VMEM((G * per_out, G * per_in), weight.dtype)],
        ),
        compiler_params=pltpu.CompilerParams(
            # Batch axis must be "arbitrary": the staged block-diagonal weight
            # scratch carries across the batch tiles of a group.  Groups stay
            # "parallel" so megacore (v7x) splits them across TensorCores.
            dimension_semantics=("parallel", "arbitrary"),
            vmem_limit_bytes=vmem_limit,
        ),
        cost_estimate=cost,
    )(x, weight)


def _reference(x, weight, num_linears):
    per_in = weight.shape[1] // num_linears
    outs = []
    for l in range(num_linears):
        sl = slice(l * per_in, (l + 1) * per_in)
        outs.append(lax.dot_general(
            x[:, sl], weight[:, sl],
            dimension_numbers=(((1,), (1,)), ((), ())),
            preferred_element_type=jnp.float32))
    return jnp.concatenate(outs, axis=-1).astype(x.dtype)


if __name__ == "__main__":
    # Small shapes consistent with the module.  num_linears chosen so the
    # grouped kernel exercises a multi-step grid: G=16 -> 512 input lanes /
    # 256 output lanes per step, grid = (4 groups, 2 batch tiles) = 8 steps.
    per_input_features = 32
    per_output_features = 16
    num_linears = 64
    batch = 256

    key = jax.random.PRNGKey(0)
    kx, kw = jax.random.split(key)

    # Mirrors weight.data.uniform_(-0.1, 0.1).
    weight = jax.random.uniform(
        kw, (per_output_features, per_input_features * num_linears),
        minval=-0.1, maxval=0.1, dtype=jnp.float32)
    x = jax.random.normal(
        kx, (batch, per_input_features * num_linears), dtype=jnp.float32)

    # f32 path (exact module semantics).  Tolerance is loose enough to be
    # robust to the TPU's default f32 matmul precision (bf16-pass based).
    out = jax.block_until_ready(linear_list_forward(x, weight, num_linears))
    ref = _reference(x, weight, num_linears)
    assert out.shape == (batch, num_linears * per_output_features)
    assert jnp.allclose(out, ref, atol=2e-2, rtol=2e-2)

    # bf16 fast path: same kernel, bf16 operands (half the HBM bytes on this
    # bandwidth-bound kernel), f32 MXU accumulation.
    xb = x.astype(jnp.bfloat16)
    wb = weight.astype(jnp.bfloat16)
    out_bf16 = jax.block_until_ready(linear_list_forward(xb, wb, num_linears))
    ref_bf16 = _reference(xb, wb, num_linears)
    assert out_bf16.shape == (batch, num_linears * per_output_features)
    assert jnp.allclose(out_bf16.astype(jnp.float32),
                        ref_bf16.astype(jnp.float32), atol=2e-2, rtol=2e-2)

    print("KERNEL_OK")
</pallas_src>

<mosaic_0001>
module attributes {stable_mosaic.version = 11 : i64} {
  func.func @_linearlist_kernel(%arg0: i32, %arg1: i32, %arg2: memref<128x512xf32, #tpu.memory_space<vmem>>, %arg3: memref<16x512xf32, #tpu.memory_space<vmem>>, %arg4: memref<128x256xf32, #tpu.memory_space<vmem>>, %arg5: memref<256x512xf32, #tpu.memory_space<vmem>>) attributes {dimension_semantics = [#tpu.dimension_semantics<parallel>, #tpu.dimension_semantics<arbitrary>], iteration_bounds = array<i64: 4, 2>, scalar_prefetch = 0 : i64, scratch_operands = 1 : i64, tpu.core_type = #tpu.core_type<tc>, window_params = [{transform_indices = @transform_0, window_bounds = array<i64: 128, 512>}, {transform_indices = @transform_1, window_bounds = array<i64: 16, 512>}, {transform_indices = @transform_2, window_bounds = array<i64: 128, 256>}]} {
    %c0_i32 = arith.constant 0 : i32
    %0 = arith.cmpi eq, %arg1, %c0_i32 : i32
    %1 = arith.extui %0 : i1 to i32
    %c0_i32_0 = arith.constant 0 : i32
    %2 = arith.cmpi ne, %1, %c0_i32_0 : i32
    scf.if %2 {
      %cst_6 = arith.constant 0.000000e+00 : f32
      %7 = vector.broadcast %cst_6 : f32 to vector<256x512xf32>
      %c0_7 = arith.constant 0 : index
      %c0_8 = arith.constant 0 : index
      %8 = vector.load %arg5[%c0_7, %c0_8] : memref<256x512xf32, #tpu.memory_space<vmem>>, vector<256x512xf32>
      tpu.vector_store %arg5[%c0_7, %c0_8], %7 {strides = array<i32>} : memref<256x512xf32, #tpu.memory_space<vmem>>, vector<256x512xf32>,
      %c0_9 = arith.constant 0 : index
      %c0_10 = arith.constant 0 : index
      %9 = vector.load %arg3[%c0_9, %c0_10] : memref<16x512xf32, #tpu.memory_space<vmem>>, vector<16x32xf32>
      %c0_11 = arith.constant 0 : index
      %c0_12 = arith.constant 0 : index
      %10 = vector.load %arg5[%c0_11, %c0_12] : memref<256x512xf32, #tpu.memory_space<vmem>>, vector<16x32xf32>
      tpu.vector_store %arg5[%c0_11, %c0_12], %9 {strides = array<i32>} : memref<256x512xf32, #tpu.memory_space<vmem>>, vector<16x32xf32>,
      %c0_13 = arith.constant 0 : index
      %c32 = arith.constant 32 : index
      %11 = vector.load %arg3[%c0_13, %c32] : memref<16x512xf32, #tpu.memory_space<vmem>>, vector<16x32xf32>
      %c16 = arith.constant 16 : index
      %c32_14 = arith.constant 32 : index
      %12 = vector.load %arg5[%c16, %c32_14] : memref<256x512xf32, #tpu.memory_space<vmem>>, vector<16x32xf32>
      tpu.vector_store %arg5[%c16, %c32_14], %11 {strides = array<i32>} : memref<256x512xf32, #tpu.memory_space<vmem>>, vector<16x32xf32>,
      %c0_15 = arith.constant 0 : index
      %c64 = arith.constant 64 : index
      %13 = vector.load %arg3[%c0_15, %c64] : memref<16x512xf32, #tpu.memory_space<vmem>>, vector<16x32xf32>
      %c32_16 = arith.constant 32 : index
      %c64_17 = arith.constant 64 : index
      %14 = vector.load %arg5[%c32_16, %c64_17] : memref<256x512xf32, #tpu.memory_space<vmem>>, vector<16x32xf32>
      tpu.vector_store %arg5[%c32_16, %c64_17], %13 {strides = array<i32>} : memref<256x512xf32, #tpu.memory_space<vmem>>, vector<16x32xf32>,
      %c0_18 = arith.constant 0 : index
      %c96 = arith.constant 96 : index
      %15 = vector.load %arg3[%c0_18, %c96] : memref<16x512xf32, #tpu.memory_space<vmem>>, vector<16x32xf32>
      %c48 = arith.constant 48 : index
      %c96_19 = arith.constant 96 : index
      %16 = vector.load %arg5[%c48, %c96_19] : memref<256x512xf32, #tpu.memory_space<vmem>>, vector<16x32xf32>
      tpu.vector_store %arg5[%c48, %c96_19], %15 {strides = array<i32>} : memref<256x512xf32, #tpu.memory_space<vmem>>, vector<16x32xf32>,
      %c0_20 = arith.constant 0 : index
      %c128 = arith.constant 128 : index
      %17 = vector.load %arg3[%c0_20, %c128] : memref<16x512xf32, #tpu.memory_space<vmem>>, vector<16x32xf32>
      %c64_21 = arith.constant 64 : index
      %c128_22 = arith.constant 128 : index
      %18 = vector.load %arg5[%c64_21, %c128_22] : memref<256x512xf32, #tpu.memory_space<vmem>>, vector<16x32xf32>
      tpu.vector_store %arg5[%c64_21, %c128_22], %17 {strides = array<i32>} : memref<256x512xf32, #tpu.memory_space<vmem>>, vector<16x32xf32>,
      %c0_23 = arith.constant 0 : index
      %c160 = arith.constant 160 : index
      %19 = vector.load %arg3[%c0_23, %c160] : memref<16x512xf32, #tpu.memory_space<vmem>>, vector<16x32xf32>
      %c80 = arith.constant 80 : index
      %c160_24 = arith.constant 160 : index
      %20 = vector.load %arg5[%c80, %c160_24] : memref<256x512xf32, #tpu.memory_space<vmem>>, vector<16x32xf32>
      tpu.vector_store %arg5[%c80, %c160_24], %19 {strides = array<i32>} : memref<256x512xf32, #tpu.memory_space<vmem>>, vector<16x32xf32>,
      %c0_25 = arith.constant 0 : index
      %c192 = arith.constant 192 : index
      %21 = vector.load %arg3[%c0_25, %c192] : memref<16x512xf32, #tpu.memory_space<vmem>>, vector<16x32xf32>
      %c96_26 = arith.constant 96 : index
      %c192_27 = arith.constant 192 : index
      %22 = vector.load %arg5[%c96_26, %c192_27] : memref<256x512xf32, #tpu.memory_space<vmem>>, vector<16x32xf32>
      tpu.vector_store %arg5[%c96_26, %c192_27], %21 {strides = array<i32>} : memref<256x512xf32, #tpu.memory_space<vmem>>, vector<16x32xf32>,
      %c0_28 = arith.constant 0 : index
      %c224 = arith.constant 224 : index
      %23 = vector.load %arg3[%c0_28, %c224] : memref<16x512xf32, #tpu.memory_space<vmem>>, vector<16x32xf32>
      %c112 = arith.constant 112 : index
      %c224_29 = arith.constant 224 : index
      %24 = vector.load %arg5[%c112, %c224_29] : memref<256x512xf32, #tpu.memory_space<vmem>>, vector<16x32xf32>
      tpu.vector_store %arg5[%c112, %c224_29], %23 {strides = array<i32>} : memref<256x512xf32, #tpu.memory_space<vmem>>, vector<16x32xf32>,
      %c0_30 = arith.constant 0 : index
      %c256 = arith.constant 256 : index
      %25 = vector.load %arg3[%c0_30, %c256] : memref<16x512xf32, #tpu.memory_space<vmem>>, vector<16x32xf32>
      %c128_31 = arith.constant 128 : index
      %c256_32 = arith.constant 256 : index
      %26 = vector.load %arg5[%c128_31, %c256_32] : memref<256x512xf32, #tpu.memory_space<vmem>>, vector<16x32xf32>
      tpu.vector_store %arg5[%c128_31, %c256_32], %25 {strides = array<i32>} : memref<256x512xf32, #tpu.memory_space<vmem>>, vector<16x32xf32>,
      %c0_33 = arith.constant 0 : index
      %c288 = arith.constant 288 : index
      %27 = vector.load %arg3[%c0_33, %c288] : memref<16x512xf32, #tpu.memory_space<vmem>>, vector<16x32xf32>
      %c144 = arith.constant 144 : index
      %c288_34 = arith.constant 288 : index
      %28 = vector.load %arg5[%c144, %c288_34] : memref<256x512xf32, #tpu.memory_space<vmem>>, vector<16x32xf32>
      tpu.vector_store %arg5[%c144, %c288_34], %27 {strides = array<i32>} : memref<256x512xf32, #tpu.memory_space<vmem>>, vector<16x32xf32>,
      %c0_35 = arith.constant 0 : index
      %c320 = arith.constant 320 : index
      %29 = vector.load %arg3[%c0_35, %c320] : memref<16x512xf32, #tpu.memory_space<vmem>>, vector<16x32xf32>
      %c160_36 = arith.constant 160 : index
      %c320_37 = arith.constant 320 : index
      %30 = vector.load %arg5[%c160_36, %c320_37] : memref<256x512xf32, #tpu.memory_space<vmem>>, vector<16x32xf32>
      tpu.vector_store %arg5[%c160_36, %c320_37], %29 {strides = array<i32>} : memref<256x512xf32, #tpu.memory_space<vmem>>, vector<16x32xf32>,
      %c0_38 = arith.constant 0 : index
      %c352 = arith.constant 352 : index
      %31 = vector.load %arg3[%c0_38, %c352] : memref<16x512xf32, #tpu.memory_space<vmem>>, vector<16x32xf32>
      %c176 = arith.constant 176 : index
      %c352_39 = arith.constant 352 : index
      %32 = vector.load %arg5[%c176, %c352_39] : memref<256x512xf32, #tpu.memory_space<vmem>>, vector<16x32xf32>
      tpu.vector_store %arg5[%c176, %c352_39], %31 {strides = array<i32>} : memref<256x512xf32, #tpu.memory_space<vmem>>, vector<16x32xf32>,
      %c0_40 = arith.constant 0 : index
      %c384 = arith.constant 384 : index
      %33 = vector.load %arg3[%c0_40, %c384] : memref<16x512xf32, #tpu.memory_space<vmem>>, vector<16x32xf32>
      %c192_41 = arith.constant 192 : index
      %c384_42 = arith.constant 384 : index
      %34 = vector.load %arg5[%c192_41, %c384_42] : memref<256x512xf32, #tpu.memory_space<vmem>>, vector<16x32xf32>
      tpu.vector_store %arg5[%c192_41, %c384_42], %33 {strides = array<i32>} : memref<256x512xf32, #tpu.memory_space<vmem>>, vector<16x32xf32>,
      %c0_43 = arith.constant 0 : index
      %c416 = arith.constant 416 : index
      %35 = vector.load %arg3[%c0_43, %c416] : memref<16x512xf32, #tpu.memory_space<vmem>>, vector<16x32xf32>
      %c208 = arith.constant 208 : index
      %c416_44 = arith.constant 416 : index
      %36 = vector.load %arg5[%c208, %c416_44] : memref<256x512xf32, #tpu.memory_space<vmem>>, vector<16x32xf32>
      tpu.vector_store %arg5[%c208, %c416_44], %35 {strides = array<i32>} : memref<256x512xf32, #tpu.memory_space<vmem>>, vector<16x32xf32>,
      %c0_45 = arith.constant 0 : index
      %c448 = arith.constant 448 : index
      %37 = vector.load %arg3[%c0_45, %c448] : memref<16x512xf32, #tpu.memory_space<vmem>>, vector<16x32xf32>
      %c224_46 = arith.constant 224 : index
      %c448_47 = arith.constant 448 : index
      %38 = vector.load %arg5[%c224_46, %c448_47] : memref<256x512xf32, #tpu.memory_space<vmem>>, vector<16x32xf32>
      tpu.vector_store %arg5[%c224_46, %c448_47], %37 {strides = array<i32>} : memref<256x512xf32, #tpu.memory_space<vmem>>, vector<16x32xf32>,
      %c0_48 = arith.constant 0 : index
      %c480 = arith.constant 480 : index
      %39 = vector.load %arg3[%c0_48, %c480] : memref<16x512xf32, #tpu.memory_space<vmem>>, vector<16x32xf32>
      %c240 = arith.constant 240 : index
      %c480_49 = arith.constant 480 : index
      %40 = vector.load %arg5[%c240, %c480_49] : memref<256x512xf32, #tpu.memory_space<vmem>>, vector<16x32xf32>
      tpu.vector_store %arg5[%c240, %c480_49], %39 {strides = array<i32>} : memref<256x512xf32, #tpu.memory_space<vmem>>, vector<16x32xf32>,
    } else {
    }
    %c0 = arith.constant 0 : index
    %c0_1 = arith.constant 0 : index
    %3 = vector.load %arg2[%c0, %c0_1] : memref<128x512xf32, #tpu.memory_space<vmem>>, vector<128x512xf32>
    %c0_2 = arith.constant 0 : index
    %c0_3 = arith.constant 0 : index
    %4 = vector.load %arg5[%c0_2, %c0_3] : memref<256x512xf32, #tpu.memory_space<vmem>>, vector<256x512xf32>
    %cst = arith.constant dense<0.000000e+00> : vector<128x256xf32>
    %5 = tpu.matmul %3, %4, %cst {dimension_numbers = #tpu.dot_dimension_numbers<[1], [1], [0], [0], [0, 0, 1, 0], [], []>} : vector<128x512xf32>, vector<256x512xf32>, vector<128x256xf32> -> vector<128x256xf32>
    %c0_4 = arith.constant 0 : index
    %c0_5 = arith.constant 0 : index
    %6 = vector.load %arg4[%c0_4, %c0_5] : memref<128x256xf32, #tpu.memory_space<vmem>>, vector<128x256xf32>
    tpu.vector_store %arg4[%c0_4, %c0_5], %5 {strides = array<i32>} : memref<128x256xf32, #tpu.memory_space<vmem>>, vector<128x256xf32>,
    return
  }
  func.func @transform_0(%arg0: i32, %arg1: i32) -> (i32, i32) {
    %c0_i32 = arith.constant 0 : i32
    return %arg1, %arg0 : i32, i32
  }
  func.func @transform_1(%arg0: i32, %arg1: i32) -> (i32, i32) {
    %c0_i32 = arith.constant 0 : i32
    %c0_i32_0 = arith.constant 0 : i32
    return %c0_i32, %arg0 : i32, i32
  }
  func.func @transform_2(%arg0: i32, %arg1: i32) -> (i32, i32) {
    %c0_i32 = arith.constant 0 : i32
    return %arg1, %arg0 : i32, i32
  }
}

</mosaic_0001>

<bundles_post_ra>
// kernel: tpu_custom_call.1
= control target key start
LH: loop header
LB: loop body
LE: loop exit
PB: predicated region body
PF: predicated region fallthrough
CT: control target
= control target key end

     0   :  { %s2212_s0 = inlined_call_operand.hbm [shape: f32[256,2048], index: 0, kind: input, shape index: {}]   ;;  %s2213_s1 = inlined_call_operand.hbm [shape: f32[16,2048], index: 1, kind: input, shape index: {}]   ;;  %s2214_s2 = inlined_call_operand.hbm [shape: f32[256,1024], index: 2, kind: output, shape index: {}]  }
   0x1   :  { %2225 = sst [smem:[#allocation15_spill]] %s2214_s2 }
   0x2   :  { %7 = vsyncpa [#allocation4], 0 }
   0x3   :  { %9 = vsyncpa [#allocation4 + $0x1], 0 }
   0x4   :  { %10 = vsyncpa [#allocation7], 0 }
   0x5   :  { %12 = vsyncpa [#allocation7 + $0x1], 0 }
   0x6   :  { %13 = vsyncpa [#allocation5], 0 }
   0x7   :  { %15 = vsyncpa [#allocation5 + $0x1], 0  ;;  %s1616_s9 = smov 0   ;;  %s1618_s10 = smov 0  }
   0x8   :  { %s1620_s11 = smov 0   ;;  %s1622_s12 = smov 0  }
   0x9   :  { %s1624_s13 = smov 0   ;;  %s1626_s14 = smov 0  }
   0xa   :  { %s1628_s15 = smov 0   ;;  %s1630_s16 = smov 0  }
   0xb   :  { %s1632_s17 = smov 0   ;;  %s1634_s18 = smov 0  }
   0xc   :  { %s1636_s19 = smov 0  }
   0xd LB: > { %2226 = sst [smem:[#allocation12_spill]] %s1561_s12  ;;  %s1102_s20 = sadd.s32 4294967295, %s1589_s19   ;;  %s1589_s19 = sphi %s1636_s19, %s21_s19   ;;  %s1585_s18 = sphi %s1634_s18, %s2259_s18   ;;  %s1581_s17 = sphi %s1632_s17, %s2258_s17   ;;  %s1577_s16 = sphi %s1630_s16, %s2257_s16   ;;  %s1573_s15 = sphi %s1628_s15, %s2256_s15   ;;  %s1569_s14 = sphi %s1626_s14, %s2255_s14   ;;  %s1565_s13 = sphi %s1624_s13, %s2254_s13   ;;  %s1561_s12 = sphi %s1622_s12, %s2253_s12   ;;  %s1557_s11 = sphi %s1620_s11, %s2252_s11   ;;  %s1553_s10 = sphi %s1618_s10, %s2251_s10   ;;  %s1549_s9 = sphi %s1616_s9, %s2250_s9  }
   0xe   : > { %s1103_s21 = sadd.s32 4294967294, %s1589_s19   ;;  %s30_s22 = sadd.s32 1, %s1581_s17 }
   0xf   : > { %s33_s23 = sadd.s32 1, %s1585_s18  ;;  %p31_p0 = scmp.ge.s32.totalorder %s30_s22, 2 }
  0x10   : > { %s42_s24 = sadd.s32 1, %s1569_s14  ;;  %p49_p1 = scmp.ne.s32.totalorder %s1569_s14, %s1565_s13 }
  0x11   : > { %p2220_p2 = scmp.eq.s32.totalorder %s1589_s19, 0  ;;  %s2261_s22 = smov (%p31_p0, %s30_s22), 0 }
  0x12   : > { %2227 = sst [smem:[#allocation13_spill]] %s2261_s22  ;;  %s2263_s23 = smov (!%p31_p0, %s33_s23), %s1585_s18 }
  0x13   : > { %s37_s25 = ssub.s32 %s1581_s17, %s2261_s22  ;;  %p1686_p3 = por %p2220_p2, %p49_p1 }
  0x14   : > { %p35_p4 = scmp.ge.s32.totalorder %s2263_s23, 4  ;;  %p55_p5 = scmp.ne.s32.totalorder %s1565_s13, %s1561_s12 }
  0x15   : > { %p1692_p6 = scmp.eq.s32.totalorder %s1102_s20, 0  ;;  %p107_p7 = scmp.eq.s32.totalorder %s1102_s20, 7 }
  0x16   : > { %s2265_s23 = smov (%p35_p4, %s2263_s23), 0  ;;  %p113_p10 = scmp.eq.s32.totalorder %s1103_s21, 7 }
  0x17   : > { %2230 = sst [smem:[#allocation14_spill]] %s2265_s23  ;;  %p1700_p8 = por %p1692_p6, %p55_p5 }
  0x18   : > { %p1704_p9 = por %p107_p7, %p49_p1  ;;  %s1710_s30 = ssub.s32 %s1585_s18, %s2265_s23 }
  0x19   : > { %s2231_s28 = scalar_select %p1700_p8, 1, 0 }
  0x1a   : > { %s2232_s29 = scalar_select %p1704_p9, 1, 0 }
  0x1b   : > { %s39_s3 = sor.u32 %s1710_s30, %s37_s25  ;;  %p1714_p13 = por %p113_p10, %p55_p5 }
  0x1c   : > { %p40_p12 = scmp.eq.s32.totalorder %s39_s3, 0  ;;  %p2219_p0 = scmp.lt.s32.totalorder %s1589_s19, 8 }
  0x1d   : > { %s2233_s4 = scalar_select %p1714_p13, 1, 0 }
  0x1e   : > { %s1720_s5 = scalar_select %p40_p12, %s1569_s14, %s42_s24  }
  0x1f   : > { %s133_s6 = sand.u32 1, %s1569_s14   ;;  %s1108_s7 = sshll.u32 %s1585_s18, 2 }
  0x20   : > { %s1106_s8 = sshll.u32 %s133_s6, 9  ;;  %s1126_s20 = sshll.u32 %s1581_s17, 8 }
  0x21   : > { %s144_s23 = sadd.s32 %s1126_s20, %s1108_s7  ;;  %s137_s22 = scalar_lea.vmem [#allocation3], %s1106_s8 }
  0x22   : > { %s147_s12 = sshll.u32 %s137_s22, 4  ;;  %s1110_s21 = sshll.u32 %s144_s23, 7  ;;  %s1725_s12 = int_to_ptr.vmem [resolvable:$true] %s147_s12 }
  0x23   : > { %s1730_s3 = scalar_lea.hbm %s2212_s0, %s1110_s21  ;;  %p1736_p1 = pnand %p2219_p0, %p1686_p3 }
  0x24   : > { %s1740_s22 = scalar_lea.sflag [#allocation4], %s133_s6  ;;  %s1403_s23 = scalar_lea.hbm %s1730_s3, 8192 }
  0x25   : > { %p1404_p4 = scmp.ne.s32.totalorder %s1730_s3, %s1403_s23  ;;  %p1405_p5 = pneg %p1736_p1 }
  0x26   : > { %s1408_s7 = scalar_lea.hbm %s2212_s0, 65536  ;;  %p1409_p3 = scmp.lt.u32.totalorder %s1730_s3, %s2212_s0 }
  0x27   : > { %p1406_p7 = pnand %p1405_p5, %p1404_p4  ;;  %p1410_p12 = scmp.lt.u32.totalorder %s1408_s7, %s1403_s23 }
  0x28   : > { %p1412_p2 = scmp.lt.u32.totalorder %s1403_s23, %s1730_s3 }
  0x29   : > { %p1407_p10 = pneg %p1406_p7  ;;  %p1411_p0 = por %p1410_p12, %p1409_p3 }
  0x2b   : > { %p1413_p11 = por %p1412_p2, %p1411_p0 }
  0x2d   : > { %p1414_p13 = pnand %p1413_p11, %p1407_p10 }
  0x2f   : > { %1417 = shalt.err (!%p1414_p13)
}
  0x30   : > { %s1418_s6 = scalar_lea.vmem %s1725_s12, 8192  ;;  %s1591_s21 = smov [#allocation3]  }
  0x31   : > { %p1419_p4 = scmp.ne.s32.totalorder %s1725_s12, %s1418_s6  ;;  %s1423_s25 = sshll.u32 %s1591_s21, 4  ;;  %s1424_s25 = int_to_ptr.vmem [resolvable:$false] %s1423_s25 }
  0x32   : > { %s1425_s2 = scalar_lea.vmem %s1424_s25, 16384  ;;  %p1426_p8 = scmp.lt.s32.totalorder %s1725_s12, %s1424_s25 }
  0x33   : > { %p1421_p7 = pnand %p1419_p4, %p1405_p5  ;;  %p1427_p3 = scmp.lt.s32.totalorder %s1425_s2, %s1418_s6 }
  0x35   : > { %p1422_p9 = pneg %p1421_p7  ;;  %p1428_p12 = por %p1427_p3, %p1426_p8 }
  0x37   : > { %p1429_p2 = pnand %p1428_p12, %p1422_p9 }
  0x39   : > { %1432 = shalt.err (!%p1429_p2)
}
  0x3a   : > { %s2223_s23 = smov 2048   ;;  %s1593_s26 = smov 512  }
  0x3b   : > { %s1594_s7 = smov 32   ;;  %p1114_p8 = scmp.ge.s32.totalorder %s1589_s19, 1 }
  0x3c   : > { %1298 = dma.hbm_to_vmem [thread:$0]  (!%p1736_p1), %s1730_s3, 8192, %s1725_s12, %s1740_s22, %s2223_s23, %s1593_s26, %s1594_s7  }
  0x3d   : > { %p176_p9 = scmp.lt.s32.totalorder %s1589_s19, 9  ;;  %s68_s20 = sadd.s32 1, %s1557_s11 }
  0x3e   : > { %p2236_p13 = scmp.eq.s32.totalorder %s1710_s30, 0  ;;  %p75_p0 = scmp.ne.s32.totalorder %s1557_s11, %s1553_s10 }
  0x3f   : > { %p1773_p11 = pnand %p1114_p8, %p176_p9  ;;  %p81_p5 = scmp.ne.s32.totalorder %s1553_s10, %s1549_s9 }
  0x40   : > { %s1781_s6 = scalar_select %p2236_p13, %s1557_s11, %s68_s20  }
  0x41   : > { %s157_s21 = sand.u32 1, %s1557_s11   ;;  %s1127_s25 = sshll.u32 %s1585_s18, 9 }
  0x42   : > { %p2237_p10 = scmp.eq.s32.totalorder %s1589_s19, 0  ;;  %p1793_p7 = por %p81_p5, %p1692_p6 }
  0x43   : > { %s1111_s3 = sshll.u32 %s157_s21, 6  ;;  %s1800_s2 = scalar_lea.hbm %s2213_s1, %s1127_s25 }
  0x44   : > { %p77_p4 = por %p75_p0, %p2237_p10  ;;  %s161_s9 = scalar_lea.vmem [#allocation6], %s1111_s3 }
  0x45   : > { %s2238_s12 = scalar_select %p1793_p7, 1, 0 }
  0x46   : > { %s168_s30 = sshll.u32 %s161_s9, 4  ;;  %p2239_p1 = scmp.lt.s32.totalorder %s1589_s19, 8  ;;  %s1808_s30 = int_to_ptr.vmem [resolvable:$true] %s168_s30 }
  0x47   : > { %s1810_s27 = scalar_lea.sflag [#allocation7], %s157_s21  ;;  %s1433_s24 = scalar_lea.hbm %s1800_s2, 1024 }
  0x48   : > { %p1804_p3 = pnand %p2239_p1, %p77_p4  ;;  %p1434_p6 = scmp.ne.s32.totalorder %s1800_s2, %s1433_s24 }
  0x49   : > { %s1438_s22 = scalar_lea.hbm %s2213_s1, 4096  ;;  %p1439_p9 = scmp.lt.u32.totalorder %s1800_s2, %s2213_s1 }
  0x4a   : > { %p1435_p12 = pneg %p1804_p3  ;;  %p1440_p13 = scmp.lt.u32.totalorder %s1438_s22, %s1433_s24 }
  0x4b   : > { %p1442_p5 = scmp.lt.u32.totalorder %s1433_s24, %s1800_s2 }
  0x4c   : > { %p1436_p2 = pnand %p1435_p12, %p1434_p6  ;;  %p1441_p0 = por %p1440_p13, %p1439_p9 }
  0x4e   : > { %p1437_p8 = pneg %p1436_p2  ;;  %p1443_p10 = por %p1442_p5, %p1441_p0 }
  0x50   : > { %p1444_p4 = pnand %p1443_p10, %p1437_p8 }
  0x52   : > { %1447 = shalt.err (!%p1444_p4)
}
  0x53   : > { %s1448_s21 = scalar_lea.vmem %s1808_s30, 1024  ;;  %s1595_s25 = smov [#allocation6]  }
  0x54   : > { %p1449_p1 = scmp.ne.s32.totalorder %s1808_s30, %s1448_s21  ;;  %s1453_s3 = sshll.u32 %s1595_s25, 4  ;;  %s1454_s3 = int_to_ptr.vmem [resolvable:$false] %s1453_s3 }
  0x55   : > { %s1455_s23 = scalar_lea.vmem %s1454_s3, 2048  ;;  %p1456_p7 = scmp.lt.s32.totalorder %s1808_s30, %s1454_s3 }
  0x56   : > { %p1451_p6 = pnand %p1449_p1, %p1435_p12  ;;  %p1457_p9 = scmp.lt.s32.totalorder %s1455_s23, %s1448_s21 }
  0x58   : > { %p1452_p2 = pneg %p1451_p6  ;;  %p1458_p13 = por %p1457_p9, %p1456_p7 }
  0x5a   : > { %p1459_p0 = pnand %p1458_p13, %p1452_p2 }
  0x5c   : > { %1462 = shalt.err (!%p1459_p0)
}
  0x5d   : > { %s2241_s24 = smov 2048   ;;  %180 = sbr.rel (%p1773_p11) target bundleno = 612 (0x264), region = 28 }
  0x5e   : > { %1301 = dma.hbm_to_vmem [thread:$0]  (!%p1804_p3), %s1800_s2, 1024, %s1808_s30, %s1810_s27, %s2241_s24, %s1593_s26, %s1594_s7  }
  0x5f   : > { %s1844_s22 = sand.u32 (!%p1773_p11), 1, %s1565_s13   ;;  %p2242_p7 = scmp.ne.s32.totalorder (!%p1773_p11), %s2231_s28, 0 }
  0x60   : > { %s1115_s9 = sshll.u32 (!%p1773_p11), %s1844_s22, 9  ;;  %s183_s21 = scalar_lea.sflag (!%p1773_p11), [#allocation4], %s1844_s22 }
  0x61   : > { %s1848_s25 = scalar_lea.vmem (!%p1773_p11), [#allocation3], %s1115_s9 }
  0x64   : > { %1536 = dma.done.wait (%p2242_p7), %s183_s21, 8192  }
  0x65   : > { %1538 = vsyncadd (%p2242_p7), %s183_s21, 4294959104  ;;  %s191_s26 = sand.u32 1, %s1553_s10   ;;  %p2243_p11 = scmp.ne.s32.totalorder %s2238_s12, 0 }
  0x66   : > { %s1116_s7 = sshll.u32 %s191_s26, 6  ;;  %s192_s8 = scalar_lea.sflag [#allocation7], %s191_s26 }
  0x67   : > { %s1855_s2 = scalar_lea.vmem [#allocation6], %s1116_s7 }
  0x68   : > { %1540 = dma.done.wait (%p2243_p11), %s192_s8, 1024  }
  0x69   : > { %1542 = vsyncadd (%p2243_p11), %s192_s8, 4294966272  ;;  %s1117_s30 = sshll.u32 %s1844_s22, 8  ;;  %p1118_p3 = scmp.ne.s32.totalorder %s1573_s15, 0 }
  0x6a   : > { %s1862_s20 = scalar_lea.vmem [#allocation8], %s1117_s30  ;;  %v1866_v0 = vld [vmem:[%s1855_s2] sm:$0xff] (!%p1118_p3)  ;;  %vm360_vm0 = vcmask (!%p1118_p3), 261120   ;;  %vm365_vm1 = vcmask (!%p1118_p3), 523520   ;;  %vm370_vm2 = vcmask (!%p1118_p3), 785920   ;;  %v1596_v2 = vmov (!%p1118_p3), 0.0  }
  0x6b   : > { %229 = sbr.rel (%p1118_p3) target bundleno = 187 (0xbb), region = 40  ;;  %v1869_v1 = vld [vmem:[%s1855_s2 + $0x20] sm:$0xff] (!%p1118_p3)  ;;  %230 = vst [vmem:[#allocation2] sm:$0xff] (!%p1118_p3), %v1596_v2  ;;  %231 = vst [vmem:[#allocation2 + $0x8] sm:$0xff] (!%p1118_p3), %v1596_v2  ;;  %vm375_vm3 = vcmask (!%p1118_p3), 1048320   ;;  %v378_v3 = vld [vmem:[%s1855_s2 + $0x8] sm:$0xff] (!%p1118_p3) }
  0x6c   : > { %232 = vst [vmem:[#allocation2 + $0x10] sm:$0xff] (!%p1118_p3), %v1596_v2  ;;  %233 = vst [vmem:[#allocation2 + $0x18] sm:$0xff] (!%p1118_p3), %v1596_v2  ;;  %v379_v4 = vld [vmem:[%s1855_s2 + $0x28] sm:$0xff] (!%p1118_p3)  ;;  %v394_v5 = vld [vmem:[%s1855_s2 + $0x10] sm:$0xff] (!%p1118_p3) }
  0x6d   : > { %234 = vst [vmem:[#allocation2 + $0x20] sm:$0xff] (!%p1118_p3), %v1596_v2  ;;  %235 = vst [vmem:[#allocation2 + $0x28] sm:$0xff] (!%p1118_p3), %v1596_v2  ;;  %v395_v6 = vld [vmem:[%s1855_s2 + $0x30] sm:$0xff] (!%p1118_p3)  ;;  %v410_v7 = vld [vmem:[%s1855_s2 + $0x18] sm:$0xff] (!%p1118_p3) }
  0x6e   : > { %236 = vst [vmem:[#allocation2 + $0x30] sm:$0xff] (!%p1118_p3), %v1596_v2  ;;  %237 = vst [vmem:[#allocation2 + $0x38] sm:$0xff] (!%p1118_p3), %v1596_v2  ;;  %v411_v8 = vld [vmem:[%s1855_s2 + $0x38] sm:$0xff] (!%p1118_p3) }
  0x6f   : > { %238 = vst [vmem:[#allocation2 + $0x40] sm:$0xff] (!%p1118_p3), %v1596_v2  ;;  %239 = vst [vmem:[#allocation2 + $0x48] sm:$0xff] (!%p1118_p3), %v1596_v2 }
  0x70   : > { %240 = vst [vmem:[#allocation2 + $0x50] sm:$0xff] (!%p1118_p3), %v1596_v2  ;;  %241 = vst [vmem:[#allocation2 + $0x58] sm:$0xff] (!%p1118_p3), %v1596_v2 }
  0x71   : > { %242 = vst [vmem:[#allocation2 + $0x60] sm:$0xff] (!%p1118_p3), %v1596_v2  ;;  %243 = vst [vmem:[#allocation2 + $0x68] sm:$0xff] (!%p1118_p3), %v1596_v2 }
  0x72   : > { %244 = vst [vmem:[#allocation2 + $0x70] sm:$0xff] %v1596_v2  ;;  %245 = vst [vmem:[#allocation2 + $0x78] sm:$0xff] %v1596_v2 }
  0x73   : > { %246 = vst [vmem:[#allocation2 + $0x80] sm:$0xff] %v1596_v2  ;;  %247 = vst [vmem:[#allocation2 + $0x88] sm:$0xff] %v1596_v2 }
  0x74   : > { %248 = vst [vmem:[#allocation2 + $0x90] sm:$0xff] %v1596_v2  ;;  %249 = vst [vmem:[#allocation2 + $0x98] sm:$0xff] %v1596_v2 }
  0x75   : > { %250 = vst [vmem:[#allocation2 + $0xa0] sm:$0xff] %v1596_v2  ;;  %251 = vst [vmem:[#allocation2 + $0xa8] sm:$0xff] %v1596_v2 }
  0x76   : > { %252 = vst [vmem:[#allocation2 + $0xb0] sm:$0xff] %v1596_v2  ;;  %253 = vst [vmem:[#allocation2 + $0xb8] sm:$0xff] %v1596_v2 }
  0x77   : > { %254 = vst [vmem:[#allocation2 + $0xc0] sm:$0xff] %v1596_v2  ;;  %255 = vst [vmem:[#allocation2 + $0xc8] sm:$0xff] %v1596_v2 }
  0x78   : > { %256 = vst [vmem:[#allocation2 + $0xd0] sm:$0xff] %v1596_v2  ;;  %257 = vst [vmem:[#allocation2 + $0xd8] sm:$0xff] %v1596_v2 }
  0x79   : > { %258 = vst [vmem:[#allocation2 + $0xe0] sm:$0xff] %v1596_v2  ;;  %259 = vst [vmem:[#allocation2 + $0xe8] sm:$0xff] %v1596_v2 }
  0x7a   : > { %260 = vst [vmem:[#allocation2 + $0xf0] sm:$0xff] %v1596_v2  ;;  %261 = vst [vmem:[#allocation2 + $0xf8] sm:$0xff] %v1596_v2 }
  0x7b   : > { %262 = vst [vmem:[#allocation2 + $0x100] sm:$0xff] %v1596_v2  ;;  %263 = vst [vmem:[#allocation2 + $0x108] sm:$0xff] %v1596_v2 }
  0x7c   : > { %264 = vst [vmem:[#allocation2 + $0x110] sm:$0xff] %v1596_v2  ;;  %265 = vst [vmem:[#allocation2 + $0x118] sm:$0xff] %v1596_v2 }
  0x7d   : > { %266 = vst [vmem:[#allocation2 + $0x120] sm:$0xff] %v1596_v2  ;;  %267 = vst [vmem:[#allocation2 + $0x128] sm:$0xff] %v1596_v2 }
  0x7e   : > { %268 = vst [vmem:[#allocation2 + $0x130] sm:$0xff] %v1596_v2  ;;  %269 = vst [vmem:[#allocation2 + $0x138] sm:$0xff] %v1596_v2 }
  0x7f   : > { %270 = vst [vmem:[#allocation2 + $0x140] sm:$0xff] %v1596_v2  ;;  %271 = vst [vmem:[#allocation2 + $0x148] sm:$0xff] %v1596_v2 }
  0x80   : > { %272 = vst [vmem:[#allocation2 + $0x150] sm:$0xff] %v1596_v2  ;;  %273 = vst [vmem:[#allocation2 + $0x158] sm:$0xff] %v1596_v2 }
  0x81   : > { %274 = vst [vmem:[#allocation2 + $0x160] sm:$0xff] %v1596_v2  ;;  %275 = vst [vmem:[#allocation2 + $0x168] sm:$0xff] %v1596_v2 }
  0x82   : > { %276 = vst [vmem:[#allocation2 + $0x170] sm:$0xff] %v1596_v2  ;;  %277 = vst [vmem:[#allocation2 + $0x178] sm:$0xff] %v1596_v2 }
  0x83   : > { %278 = vst [vmem:[#allocation2 + $0x180] sm:$0xff] %v1596_v2  ;;  %279 = vst [vmem:[#allocation2 + $0x188] sm:$0xff] %v1596_v2 }
  0x84   : > { %280 = vst [vmem:[#allocation2 + $0x190] sm:$0xff] %v1596_v2  ;;  %281 = vst [vmem:[#allocation2 + $0x198] sm:$0xff] %v1596_v2 }
  0x85   : > { %282 = vst [vmem:[#allocation2 + $0x1a0] sm:$0xff] %v1596_v2  ;;  %283 = vst [vmem:[#allocation2 + $0x1a8] sm:$0xff] %v1596_v2 }
  0x86   : > { %284 = vst [vmem:[#allocation2 + $0x1b0] sm:$0xff] %v1596_v2  ;;  %285 = vst [vmem:[#allocation2 + $0x1b8] sm:$0xff] %v1596_v2 }
  0x87   : > { %286 = vst [vmem:[#allocation2 + $0x1c0] sm:$0xff] %v1596_v2  ;;  %287 = vst [vmem:[#allocation2 + $0x1c8] sm:$0xff] %v1596_v2 }
  0x88   : > { %288 = vst [vmem:[#allocation2 + $0x1d0] sm:$0xff] %v1596_v2  ;;  %289 = vst [vmem:[#allocation2 + $0x1d8] sm:$0xff] %v1596_v2 }
  0x89   : > { %290 = vst [vmem:[#allocation2 + $0x1e0] sm:$0xff] %v1596_v2  ;;  %291 = vst [vmem:[#allocation2 + $0x1e8] sm:$0xff] %v1596_v2 }
  0x8a   : > { %292 = vst [vmem:[#allocation2 + $0x1f0] sm:$0xff] %v1596_v2  ;;  %293 = vst [vmem:[#allocation2 + $0x1f8] sm:$0xff] %v1596_v2 }
  0x8b   : > { %294 = vst [vmem:[#allocation2 + $0x200] sm:$0xff] %v1596_v2  ;;  %295 = vst [vmem:[#allocation2 + $0x208] sm:$0xff] %v1596_v2 }
  0x8c   : > { %296 = vst [vmem:[#allocation2 + $0x210] sm:$0xff] %v1596_v2  ;;  %297 = vst [vmem:[#allocation2 + $0x218] sm:$0xff] %v1596_v2 }
  0x8d   : > { %298 = vst [vmem:[#allocation2 + $0x220] sm:$0xff] %v1596_v2  ;;  %299 = vst [vmem:[#allocation2 + $0x228] sm:$0xff] %v1596_v2 }
  0x8e   : > { %300 = vst [vmem:[#allocation2 + $0x230] sm:$0xff] %v1596_v2  ;;  %301 = vst [vmem:[#allocation2 + $0x238] sm:$0xff] %v1596_v2 }
  0x8f   : > { %302 = vst [vmem:[#allocation2 + $0x240] sm:$0xff] %v1596_v2  ;;  %303 = vst [vmem:[#allocation2 + $0x248] sm:$0xff] %v1596_v2 }
  0x90   : > { %304 = vst [vmem:[#allocation2 + $0x250] sm:$0xff] %v1596_v2  ;;  %305 = vst [vmem:[#allocation2 + $0x258] sm:$0xff] %v1596_v2 }
  0x91   : > { %306 = vst [vmem:[#allocation2 + $0x260] sm:$0xff] %v1596_v2  ;;  %307 = vst [vmem:[#allocation2 + $0x268] sm:$0xff] %v1596_v2 }
  0x92   : > { %308 = vst [vmem:[#allocation2 + $0x270] sm:$0xff] %v1596_v2  ;;  %309 = vst [vmem:[#allocation2 + $0x278] sm:$0xff] %v1596_v2 }
  0x93   : > { %310 = vst [vmem:[#allocation2 + $0x280] sm:$0xff] %v1596_v2  ;;  %311 = vst [vmem:[#allocation2 + $0x288] sm:$0xff] %v1596_v2 }
  0x94   : > { %312 = vst [vmem:[#allocation2 + $0x290] sm:$0xff] %v1596_v2  ;;  %313 = vst [vmem:[#allocation2 + $0x298] sm:$0xff] %v1596_v2 }
  0x95   : > { %314 = vst [vmem:[#allocation2 + $0x2a0] sm:$0xff] %v1596_v2  ;;  %315 = vst [vmem:[#allocation2 + $0x2a8] sm:$0xff] %v1596_v2 }
  0x96   : > { %316 = vst [vmem:[#allocation2 + $0x2b0] sm:$0xff] %v1596_v2  ;;  %317 = vst [vmem:[#allocation2 + $0x2b8] sm:$0xff] %v1596_v2 }
  0x97   : > { %318 = vst [vmem:[#allocation2 + $0x2c0] sm:$0xff] %v1596_v2  ;;  %319 = vst [vmem:[#allocation2 + $0x2c8] sm:$0xff] %v1596_v2 }
  0x98   : > { %320 = vst [vmem:[#allocation2 + $0x2d0] sm:$0xff] %v1596_v2  ;;  %321 = vst [vmem:[#allocation2 + $0x2d8] sm:$0xff] %v1596_v2 }
  0x99   : > { %322 = vst [vmem:[#allocation2 + $0x2e0] sm:$0xff] %v1596_v2  ;;  %323 = vst [vmem:[#allocation2 + $0x2e8] sm:$0xff] %v1596_v2 }
  0x9a   : > { %324 = vst [vmem:[#allocation2 + $0x2f0] sm:$0xff] %v1596_v2  ;;  %325 = vst [vmem:[#allocation2 + $0x2f8] sm:$0xff] %v1596_v2 }
  0x9b   : > { %326 = vst [vmem:[#allocation2 + $0x300] sm:$0xff] %v1596_v2  ;;  %327 = vst [vmem:[#allocation2 + $0x308] sm:$0xff] %v1596_v2 }
  0x9c   : > { %328 = vst [vmem:[#allocation2 + $0x310] sm:$0xff] %v1596_v2  ;;  %329 = vst [vmem:[#allocation2 + $0x318] sm:$0xff] %v1596_v2 }
  0x9d   : > { %330 = vst [vmem:[#allocation2 + $0x320] sm:$0xff] %v1596_v2  ;;  %331 = vst [vmem:[#allocation2 + $0x328] sm:$0xff] %v1596_v2 }
  0x9e   : > { %332 = vst [vmem:[#allocation2 + $0x330] sm:$0xff] %v1596_v2  ;;  %333 = vst [vmem:[#allocation2 + $0x338] sm:$0xff] %v1596_v2 }
  0x9f   : > { %334 = vst [vmem:[#allocation2 + $0x340] sm:$0xff] %v1596_v2  ;;  %335 = vst [vmem:[#allocation2 + $0x348] sm:$0xff] %v1596_v2 }
  0xa0   : > { %336 = vst [vmem:[#allocation2 + $0x350] sm:$0xff] %v1596_v2  ;;  %337 = vst [vmem:[#allocation2 + $0x358] sm:$0xff] %v1596_v2 }
  0xa1   : > { %338 = vst [vmem:[#allocation2 + $0x360] sm:$0xff] %v1596_v2  ;;  %339 = vst [vmem:[#allocation2 + $0x368] sm:$0xff] %v1596_v2 }
  0xa2   : > { %340 = vst [vmem:[#allocation2 + $0x370] sm:$0xff] %v1596_v2  ;;  %341 = vst [vmem:[#allocation2 + $0x378] sm:$0xff] %v1596_v2 }
  0xa3   : > { %342 = vst [vmem:[#allocation2 + $0x380] sm:$0xff] %v1596_v2  ;;  %343 = vst [vmem:[#allocation2 + $0x388] sm:$0xff] %v1596_v2 }
  0xa4   : > { %344 = vst [vmem:[#allocation2 + $0x390] sm:$0xff] %v1596_v2  ;;  %345 = vst [vmem:[#allocation2 + $0x398] sm:$0xff] %v1596_v2 }
  0xa5   : > { %346 = vst [vmem:[#allocation2 + $0x3a0] sm:$0xff] %v1596_v2  ;;  %347 = vst [vmem:[#allocation2 + $0x3a8] sm:$0xff] %v1596_v2 }
  0xa6   : > { %348 = vst [vmem:[#allocation2 + $0x3b0] sm:$0xff] %v1596_v2  ;;  %349 = vst [vmem:[#allocation2 + $0x3b8] sm:$0xff] %v1596_v2 }
  0xa7   : > { %350 = vst [vmem:[#allocation2 + $0x3c0] sm:$0xff] %v1596_v2  ;;  %351 = vst [vmem:[#allocation2 + $0x3c8] sm:$0xff] %v1596_v2 }
  0xa8   : > { %352 = vst [vmem:[#allocation2 + $0x3d0] sm:$0xff] %v1596_v2  ;;  %353 = vst [vmem:[#allocation2 + $0x3d8] sm:$0xff] %v1596_v2 }
  0xa9   : > { %354 = vst [vmem:[#allocation2 + $0x3e0] sm:$0xff] %v1596_v2  ;;  %355 = vst [vmem:[#allocation2 + $0x3e8] sm:$0xff] %v1596_v2 }
  0xaa   : > { %356 = vst [vmem:[#allocation2 + $0x3f0] sm:$0xff] %v1596_v2  ;;  %357 = vst [vmem:[#allocation2 + $0x3f8] sm:$0xff] %v1596_v2 }
  0xab   : > { %361 = vst.msk [vmem:[#allocation2] sm:$0xff] %vm360_vm0, %v1866_v0  ;;  %362 = vst.msk [vmem:[#allocation2 + $0x20] sm:$0xff] %vm360_vm0, %v1869_v1 }
  0xac   : > { %366 = vst.msk [vmem:[#allocation2 + $0x40] sm:$0xff] %vm365_vm1, %v1866_v0  ;;  %367 = vst.msk [vmem:[#allocation2 + $0x60] sm:$0xff] %vm365_vm1, %v1869_v1 }
  0xad   : > { %371 = vst.msk [vmem:[#allocation2 + $0x80] sm:$0xff] %vm370_vm2, %v1866_v0  ;;  %372 = vst.msk [vmem:[#allocation2 + $0xa0] sm:$0xff] %vm370_vm2, %v1869_v1 }
  0xae   : > { %376 = vst.msk [vmem:[#allocation2 + $0xc0] sm:$0xff] %vm375_vm3, %v1866_v0  ;;  %377 = vst.msk [vmem:[#allocation2 + $0xe0] sm:$0xff] %vm375_vm3, %v1869_v1 }
  0xaf   : > { %380 = vst.msk [vmem:[#allocation2 + $0x108] sm:$0xff] %vm360_vm0, %v378_v3  ;;  %381 = vst.msk [vmem:[#allocation2 + $0x128] sm:$0xff] %vm360_vm0, %v379_v4 }
  0xb0   : > { %384 = vst.msk [vmem:[#allocation2 + $0x148] sm:$0xff] %vm365_vm1, %v378_v3  ;;  %385 = vst.msk [vmem:[#allocation2 + $0x168] sm:$0xff] %vm365_vm1, %v379_v4 }
  0xb1   : > { %388 = vst.msk [vmem:[#allocation2 + $0x188] sm:$0xff] %vm370_vm2, %v378_v3  ;;  %389 = vst.msk [vmem:[#allocation2 + $0x1a8] sm:$0xff] %vm370_vm2, %v379_v4 }
  0xb2   : > { %392 = vst.msk [vmem:[#allocation2 + $0x1c8] sm:$0xff] %vm375_vm3, %v378_v3  ;;  %393 = vst.msk [vmem:[#allocation2 + $0x1e8] sm:$0xff] %vm375_vm3, %v379_v4 }
  0xb3   : > { %396 = vst.msk [vmem:[#allocation2 + $0x210] sm:$0xff] %vm360_vm0, %v394_v5  ;;  %397 = vst.msk [vmem:[#allocation2 + $0x230] sm:$0xff] %vm360_vm0, %v395_v6 }
  0xb4   : > { %400 = vst.msk [vmem:[#allocation2 + $0x250] sm:$0xff] %vm365_vm1, %v394_v5  ;;  %401 = vst.msk [vmem:[#allocation2 + $0x270] sm:$0xff] %vm365_vm1, %v395_v6 }
  0xb5   : > { %404 = vst.msk [vmem:[#allocation2 + $0x290] sm:$0xff] %vm370_vm2, %v394_v5  ;;  %405 = vst.msk [vmem:[#allocation2 + $0x2b0] sm:$0xff] %vm370_vm2, %v395_v6 }
  0xb6   : > { %408 = vst.msk [vmem:[#allocation2 + $0x2d0] sm:$0xff] %vm375_vm3, %v394_v5  ;;  %409 = vst.msk [vmem:[#allocation2 + $0x2f0] sm:$0xff] %vm375_vm3, %v395_v6 }
  0xb7   : > { %412 = vst.msk [vmem:[#allocation2 + $0x318] sm:$0xff] %vm360_vm0, %v410_v7  ;;  %413 = vst.msk [vmem:[#allocation2 + $0x338] sm:$0xff] %vm360_vm0, %v411_v8 }
  0xb8   : > { %416 = vst.msk [vmem:[#allocation2 + $0x358] sm:$0xff] %vm365_vm1, %v410_v7  ;;  %417 = vst.msk [vmem:[#allocation2 + $0x378] sm:$0xff] %vm365_vm1, %v411_v8 }
  0xb9   : > { %420 = vst.msk [vmem:[#allocation2 + $0x398] sm:$0xff] %vm370_vm2, %v410_v7  ;;  %421 = vst.msk [vmem:[#allocation2 + $0x3b8] sm:$0xff] %vm370_vm2, %v411_v8 }
  0xba   : > { %424 = vst.msk [vmem:[#allocation2 + $0x3d8] sm:$0xff] %vm375_vm3, %v410_v7  ;;  %425 = vst.msk [vmem:[#allocation2 + $0x3f8] sm:$0xff] %vm375_vm3, %v411_v8 }
  0xbb PF: > { %v491_v9 = vld [vmem:[#allocation2 + $0x8] sm:$0xff]  ;;  %v490_v14 = vld [vmem:[#allocation2] sm:$0xff]  ;;  %v509_v33 = vld [vmem:[#allocation2 + $0x98] sm:$0xff]  ;;  %s1121_s28 = sshll.u32 %s1577_s16, 1  ;;  %s1128_s12 = sshll.u32 %s1573_s15, 7 }
  0xbc   : > { %v493_v11 = vld [vmem:[#allocation2 + $0x18] sm:$0xff]  ;;  %v492_v18 = vld [vmem:[#allocation2 + $0x10] sm:$0xff]  ;;  %v507_v31 = vld [vmem:[#allocation2 + $0x88] sm:$0xff]  ;;  %s986_s27 = sadd.s32 %s1128_s12, %s1121_s28  ;;  %s989_s16 = sshll.u32 %s1862_s20, 4  ;;  %s2147_s16 = int_to_ptr.vmem [resolvable:$true] %s989_s16 }
  0xbd   : > { %v495_v10 = vld [vmem:[#allocation2 + $0x28] sm:$0xff]  ;;  %v494_v15 = vld [vmem:[#allocation2 + $0x20] sm:$0xff]  ;;  %v513_v34 = vld [vmem:[#allocation2 + $0xb8] sm:$0xff]  ;;  %s1123_s15 = sshll.u32 %s986_s27, 7  ;;  %s2244_s24 = sld [smem:[#allocation15_spill]] }
  0xbe   : > { %v1129_v12 = vpack.c.bf16 %v495_v10, %v491_v9  ;;  %v497_v13 = vld [vmem:[#allocation2 + $0x38] sm:$0xff]  ;;  %v1131_v17 = vpack.c.bf16 %v494_v15, %v490_v14  ;;  %v496_v19 = vld [vmem:[#allocation2 + $0x30] sm:$0xff]  ;;  %v511_v32 = vld [vmem:[#allocation2 + $0xa8] sm:$0xff]  ;;  %v1201_v38 = vpack.c.bf16 %v513_v34, %v509_v33  ;;  %s973_s21 = scalar_lea.sflag [#allocation5], %s1844_s22  ;;  %p2245_p8 = scmp.ne.s32.totalorder %s2232_s29, 0 }
  0xbf   : > { %v1193_v16 = vpack.c.bf16 %v497_v13, %v493_v11  ;;  %v499_v20 = vld [vmem:[#allocation2 + $0x48] sm:$0xff]  ;;  %v1195_v21 = vpack.c.bf16 %v496_v19, %v492_v18  ;;  %v498_v27 = vld [vmem:[#allocation2 + $0x40] sm:$0xff]  ;;  %v1137_v37 = vpack.c.bf16 %v511_v32, %v507_v31  ;;  %v508_v41 = vld [vmem:[#allocation2 + $0x90] sm:$0xff]  ;;  %s1597_s26 = smov [#allocation8]  }
  0xc0   : > { %1130 = vmatprep.subr.bf16.mxu1 %v1129_v12  ;;  %v501_v23 = vld [vmem:[#allocation2 + $0x58] sm:$0xff]  ;;  %v500_v29 = vld [vmem:[#allocation2 + $0x50] sm:$0xff]  ;;  %v506_v39 = vld [vmem:[#allocation2 + $0x80] sm:$0xff]  ;;  %s1467_s7 = sshll.u32 %s1597_s26, 4  ;;  %s1468_s7 = int_to_ptr.vmem [resolvable:$false] %s1467_s7 }
  0xc1   : > { %v503_v22 = vld [vmem:[#allocation2 + $0x68] sm:$0xff]  ;;  %1194 = vmatprep.subr.bf16.mxu0 %v1193_v16  ;;  %1132 = vmatpush1.bf16.xpose.msra.mxu1 %v1131_v17  ;;  %v502_v28 = vld [vmem:[#allocation2 + $0x60] sm:$0xff]  ;;  %v512_v42 = vld [vmem:[#allocation2 + $0xb0] sm:$0xff]  ;;  %s1469_s8 = scalar_lea.vmem %s1468_s7, 8192  ;;  %p1470_p4 = scmp.lt.s32.totalorder %s2147_s16, %s1468_s7 }
  0xc2   : > { %v505_v24 = vld [vmem:[#allocation2 + $0x78] sm:$0xff]  ;;  %v1133_v25 = vpack.c.bf16 %v503_v22, %v499_v20  ;;  %1196 = vmatpush1.bf16.xpose.msra.mxu0 %v1195_v21  ;;  %v504_v30 = vld [vmem:[#allocation2 + $0x70] sm:$0xff]  ;;  %v1135_v35 = vpack.c.bf16 %v502_v28, %v498_v27  ;;  %v510_v40 = vld [vmem:[#allocation2 + $0xa0] sm:$0xff]  ;;  %v1203_v48 = vpack.c.bf16 %v512_v42, %v508_v41 }
  0xc3   : > { %v1197_v26 = vpack.c.bf16 %v505_v24, %v501_v23  ;;  %v1199_v36 = vpack.c.bf16 %v504_v30, %v500_v29  ;;  %v515_v43 = vld [vmem:[#allocation2 + $0xc8] sm:$0xff]  ;;  %v517_v45 = vld [vmem:[#allocation2 + $0xd8] sm:$0xff]  ;;  %v1139_v47 = vpack.c.bf16 %v510_v40, %v506_v39  ;;  %v514_v51 = vld [vmem:[#allocation2 + $0xc0] sm:$0xff]  ;;  %s2145_s9 = scalar_lea.hbm %s2244_s24, %s1123_s15 }
  0xc4   : > { %1134 = vmatprep.subr.bf16.mxu1 %v1133_v25  ;;  %v519_v44 = vld [vmem:[#allocation2 + $0xe8] sm:$0xff]  ;;  %v521_v46 = vld [vmem:[#allocation2 + $0xf8] sm:$0xff]  ;;  %v518_v52 = vld [vmem:[#allocation2 + $0xe0] sm:$0xff] }
  0xc5   : > { %1198 = vmatprep.subr.bf16.mxu0 %v1197_v26  ;;  %v1141_v49 = vpack.c.bf16 %v519_v44, %v515_v43  ;;  %v1205_v50 = vpack.c.bf16 %v521_v46, %v517_v45  ;;  %v516_v53 = vld [vmem:[#allocation2 + $0xd0] sm:$0xff]  ;;  %v523_v55 = vld [vmem:[#allocation2 + $0x108] sm:$0xff]  ;;  %v525_v57 = vld [vmem:[#allocation2 + $0x118] sm:$0xff]  ;;  %v1143_v59 = vpack.c.bf16 %v518_v52, %v514_v51 }
  0xc6   : > { %v520_v54 = vld [vmem:[#allocation2 + $0xf0] sm:$0xff]  ;;  %v527_v56 = vld [vmem:[#allocation2 + $0x128] sm:$0xff]  ;;  %v529_v58 = vld [vmem:[#allocation2 + $0x138] sm:$0xff] }
  0xc7   : > { %v1207_v60 = vpack.c.bf16 %v520_v54, %v516_v53  ;;  %v1145_v61 = vpack.c.bf16 %v527_v56, %v523_v55  ;;  %v1209_v62 = vpack.c.bf16 %v529_v58, %v525_v57  ;;  %v522_v63 = vld [vmem:[#allocation2 + $0x100] sm:$0xff]  ;;  %v524_v1 = vld [vmem:[#allocation2 + $0x110] sm:$0xff]  ;;  %v531_v3 = vld [vmem:[#allocation2 + $0x148] sm:$0xff] }
  0xc8   : > { %v526_v0 = vld [vmem:[#allocation2 + $0x120] sm:$0xff]  ;;  %v528_v2 = vld [vmem:[#allocation2 + $0x130] sm:$0xff]  ;;  %v535_v4 = vld [vmem:[#allocation2 + $0x168] sm:$0xff] }
  0xc9   : > { %1136 = vmatpush1.bf16.xpose.msra.mxu1 %v1135_v35  ;;  %v533_v5 = vld [vmem:[#allocation2 + $0x158] sm:$0xff]  ;;  %v1147_v7 = vpack.c.bf16 %v526_v0, %v522_v63  ;;  %v1211_v8 = vpack.c.bf16 %v528_v2, %v524_v1  ;;  %v1149_v9 = vpack.c.bf16 %v535_v4, %v531_v3  ;;  %v530_v11 = vld [vmem:[#allocation2 + $0x140] sm:$0xff]  ;;  %v532_v13 = vld [vmem:[#allocation2 + $0x150] sm:$0xff] }
  0xca   : > { %1200 = vmatpush1.bf16.xpose.msra.mxu0 %v1199_v36  ;;  %1138 = vmatprep.subr.bf16.mxu1 %v1137_v37  ;;  %v537_v6 = vld [vmem:[#allocation2 + $0x178] sm:$0xff]  ;;  %v534_v12 = vld [vmem:[#allocation2 + $0x160] sm:$0xff]  ;;  %v536_v14 = vld [vmem:[#allocation2 + $0x170] sm:$0xff] }
  0xcb   : > { %1202 = vmatprep.subr.bf16.mxu0 %v1201_v38  ;;  %v1213_v10 = vpack.c.bf16 %v537_v6, %v533_v5  ;;  %v539_v15 = vld [vmem:[#allocation2 + $0x188] sm:$0xff]  ;;  %v541_v17 = vld [vmem:[#allocation2 + $0x198] sm:$0xff]  ;;  %v1151_v19 = vpack.c.bf16 %v534_v12, %v530_v11  ;;  %v1215_v20 = vpack.c.bf16 %v536_v14, %v532_v13  ;;  %v538_v25 = vld [vmem:[#allocation2 + $0x180] sm:$0xff] }
  0xcc   : > { %v543_v16 = vld [vmem:[#allocation2 + $0x1a8] sm:$0xff]  ;;  %v545_v18 = vld [vmem:[#allocation2 + $0x1b8] sm:$0xff]  ;;  %v542_v26 = vld [vmem:[#allocation2 + $0x1a0] sm:$0xff] }
  0xcd   : > { %v1153_v21 = vpack.c.bf16 %v543_v16, %v539_v15  ;;  %v1217_v22 = vpack.c.bf16 %v545_v18, %v541_v17  ;;  %v427_v23 = vld [vmem:[%s1848_s25 + $0x8] sm:$0xff]  ;;  %v429_v24 = vld [vmem:[%s1848_s25 + $0x18] sm:$0xff]  ;;  %v540_v27 = vld [vmem:[#allocation2 + $0x190] sm:$0xff]  ;;  %v1155_v33 = vpack.c.bf16 %v542_v26, %v538_v25 }
  0xce   : > { %682 = vmatprep.mubr.f32.mxu1 %v427_v23  ;;  %843 = vmatprep.mubr.f32.mxu0 %v429_v24  ;;  %v544_v28 = vld [vmem:[#allocation2 + $0x1b0] sm:$0xff]  ;;  %v547_v29 = vld [vmem:[#allocation2 + $0x1c8] sm:$0xff]  ;;  %v549_v31 = vld [vmem:[#allocation2 + $0x1d8] sm:$0xff] }
  0xcf   : > { %v551_v30 = vld [vmem:[#allocation2 + $0x1e8] sm:$0xff]  ;;  %v553_v32 = vld [vmem:[#allocation2 + $0x1f8] sm:$0xff]  ;;  %v1219_v34 = vpack.c.bf16 %v544_v28, %v540_v27  ;;  %v546_v37 = vld [vmem:[#allocation2 + $0x1c0] sm:$0xff] }
  0xd0   : > { %v1157_v35 = vpack.c.bf16 %v551_v30, %v547_v29  ;;  %v1221_v36 = vpack.c.bf16 %v553_v32, %v549_v31  ;;  %v550_v38 = vld [vmem:[#allocation2 + $0x1e0] sm:$0xff]  ;;  %v548_v39 = vld [vmem:[#allocation2 + $0x1d0] sm:$0xff]  ;;  %v555_v41 = vld [vmem:[#allocation2 + $0x208] sm:$0xff] }
  0xd1   : > { %1140 = vmatpush1.bf16.xpose.msra.mxu1 %v1139_v47  ;;  %v552_v40 = vld [vmem:[#allocation2 + $0x1f0] sm:$0xff]  ;;  %v559_v42 = vld [vmem:[#allocation2 + $0x228] sm:$0xff]  ;;  %v557_v43 = vld [vmem:[#allocation2 + $0x218] sm:$0xff]  ;;  %v1159_v45 = vpack.c.bf16 %v550_v38, %v546_v37 }
  0xd2   : > { %1204 = vmatpush1.bf16.xpose.msra.mxu0 %v1203_v48  ;;  %1142 = vmatprep.subr.bf16.mxu1 %v1141_v49  ;;  %v561_v44 = vld [vmem:[#allocation2 + $0x238] sm:$0xff]  ;;  %v1223_v46 = vpack.c.bf16 %v552_v40, %v548_v39  ;;  %v1161_v47 = vpack.c.bf16 %v559_v42, %v555_v41  ;;  %v554_v49 = vld [vmem:[#allocation2 + $0x200] sm:$0xff]  ;;  %v556_v51 = vld [vmem:[#allocation2 + $0x210] sm:$0xff] }
  0xd3   : > { %1206 = vmatprep.subr.bf16.mxu0 %v1205_v50  ;;  %v1225_v48 = vpack.c.bf16 %v561_v44, %v557_v43  ;;  %v558_v50 = vld [vmem:[#allocation2 + $0x220] sm:$0xff]  ;;  %v560_v52 = vld [vmem:[#allocation2 + $0x230] sm:$0xff]  ;;  %v563_v53 = vld [vmem:[#allocation2 + $0x248] sm:$0xff] }
  0xd4   : > { %v567_v54 = vld [vmem:[#allocation2 + $0x268] sm:$0xff]  ;;  %v565_v55 = vld [vmem:[#allocation2 + $0x258] sm:$0xff]  ;;  %v1163_v57 = vpack.c.bf16 %v558_v50, %v554_v49  ;;  %v1227_v58 = vpack.c.bf16 %v560_v52, %v556_v51  ;;  %v564_v63 = vld [vmem:[#allocation2 + $0x250] sm:$0xff] }
  0xd5   : > { %v569_v56 = vld [vmem:[#allocation2 + $0x278] sm:$0xff]  ;;  %v568_v0 = vld [vmem:[#allocation2 + $0x270] sm:$0xff]  ;;  %v571_v1 = vld [vmem:[#allocation2 + $0x288] sm:$0xff] }
  0xd6   : > { %v575_v2 = vld [vmem:[#allocation2 + $0x2a8] sm:$0xff]  ;;  %v573_v3 = vld [vmem:[#allocation2 + $0x298] sm:$0xff]  ;;  %v1231_v6 = vpack.c.bf16 %v568_v0, %v564_v63  ;;  %v572_v11 = vld [vmem:[#allocation2 + $0x290] sm:$0xff] }
  0xd7   : > { %v577_v4 = vld [vmem:[#allocation2 + $0x2b8] sm:$0xff]  ;;  %v576_v12 = vld [vmem:[#allocation2 + $0x2b0] sm:$0xff]  ;;  %v579_v13 = vld [vmem:[#allocation2 + $0x2c8] sm:$0xff] }
  0xd8   : > { %v583_v14 = vld [vmem:[#allocation2 + $0x2e8] sm:$0xff]  ;;  %v581_v15 = vld [vmem:[#allocation2 + $0x2d8] sm:$0xff]  ;;  %v1235_v18 = vpack.c.bf16 %v576_v12, %v572_v11  ;;  %v580_v23 = vld [vmem:[#allocation2 + $0x2d0] sm:$0xff] }
  0xd9   : > { %1144 = vmatpush1.bf16.xpose.msra.mxu1 %v1143_v59  ;;  %v1165_v59 = vpack.c.bf16 %v567_v54, %v563_v53  ;;  %v585_v16 = vld [vmem:[#allocation2 + $0x2f8] sm:$0xff]  ;;  %v584_v24 = vld [vmem:[#allocation2 + $0x2f0] sm:$0xff]  ;;  %v587_v25 = vld [vmem:[#allocation2 + $0x308] sm:$0xff] }
  0xda   : > { %1208 = vmatpush1.bf16.xpose.msra.mxu0 %v1207_v60  ;;  %1146 = vmatprep.subr.bf16.mxu1 %v1145_v61  ;;  %v1229_v60 = vpack.c.bf16 %v569_v56, %v565_v55  ;;  %v562_v61 = vld [vmem:[#allocation2 + $0x240] sm:$0xff]  ;;  %v591_v26 = vld [vmem:[#allocation2 + $0x328] sm:$0xff]  ;;  %v589_v27 = vld [vmem:[#allocation2 + $0x318] sm:$0xff]  ;;  %v1239_v30 = vpack.c.bf16 %v584_v24, %v580_v23 }
  0xdb   : > { %1210 = vmatprep.subr.bf16.mxu0 %v1209_v62  ;;  %v566_v62 = vld [vmem:[#allocation2 + $0x260] sm:$0xff]  ;;  %v593_v28 = vld [vmem:[#allocation2 + $0x338] sm:$0xff]  ;;  %v1177_v31 = vpack.c.bf16 %v591_v26, %v587_v25  ;;  %v595_v37 = vld [vmem:[#allocation2 + $0x348] sm:$0xff] }
  0xdc   : > { %v1167_v5 = vpack.c.bf16 %v566_v62, %v562_v61  ;;  %v1241_v32 = vpack.c.bf16 %v593_v28, %v589_v27  ;;  %v599_v38 = vld [vmem:[#allocation2 + $0x368] sm:$0xff]  ;;  %v597_v39 = vld [vmem:[#allocation2 + $0x358] sm:$0xff]  ;;  %v426_v11 = vld [vmem:[%s1848_s25] sm:$0xff] }
  0xdd   : > { %v601_v40 = vld [vmem:[#allocation2 + $0x378] sm:$0xff]  ;;  %v1181_v43 = vpack.c.bf16 %v599_v38, %v595_v37  ;;  %v603_v49 = vld [vmem:[#allocation2 + $0x388] sm:$0xff]  ;;  %v428_v12 = vld [vmem:[%s1848_s25 + $0x10] sm:$0xff] }
  0xde   : > { %v1245_v44 = vpack.c.bf16 %v601_v40, %v597_v39  ;;  %v607_v50 = vld [vmem:[#allocation2 + $0x3a8] sm:$0xff]  ;;  %v605_v51 = vld [vmem:[#allocation2 + $0x398] sm:$0xff]  ;;  %v438_v23 = vld [vmem:[%s1848_s25 + $0x60] sm:$0xff] }
  0xdf   : > { %v609_v52 = vld [vmem:[#allocation2 + $0x3b8] sm:$0xff]  ;;  %v1185_v55 = vpack.c.bf16 %v607_v50, %v603_v49  ;;  %v611_v61 = vld [vmem:[#allocation2 + $0x3c8] sm:$0xff]  ;;  %v440_v24 = vld [vmem:[%s1848_s25 + $0x70] sm:$0xff] }
  0xe0   : > { %v1249_v56 = vpack.c.bf16 %v609_v52, %v605_v51  ;;  %v615_v62 = vld [vmem:[#allocation2 + $0x3e8] sm:$0xff]  ;;  %v613_v63 = vld [vmem:[#allocation2 + $0x3d8] sm:$0xff]  ;;  %v442_v27 = vld [vmem:[%s1848_s25 + $0x80] sm:$0xff] }
  0xe1   : > { %1148 = vmatpush1.bf16.xpose.msra.mxu1 %v1147_v7  ;;  %v1169_v7 = vpack.c.bf16 %v575_v2, %v571_v1  ;;  %v617_v0 = vld [vmem:[#allocation2 + $0x3f8] sm:$0xff]  ;;  %v443_v25 = vld [vmem:[%s1848_s25 + $0x88] sm:$0xff]  ;;  %v444_v28 = vld [vmem:[%s1848_s25 + $0x90] sm:$0xff] }
  0xe2   : > { %1212 = vmatpush1.bf16.xpose.msra.mxu0 %v1211_v8  ;;  %1150 = vmatprep.subr.bf16.mxu1 %v1149_v9  ;;  %v1233_v8 = vpack.c.bf16 %v577_v4, %v573_v3  ;;  %v570_v9 = vld [vmem:[#allocation2 + $0x280] sm:$0xff]  ;;  %v1189_v3 = vpack.c.bf16 %v615_v62, %v611_v61  ;;  %v1253_v4 = vpack.c.bf16 %v617_v0, %v613_v63  ;;  %v445_v26 = vld [vmem:[%s1848_s25 + $0x98] sm:$0xff]  ;;  %v455_v37 = vld [vmem:[%s1848_s25 + $0xe8] sm:$0xff] }
  0xe3   : > { %1214 = vmatprep.subr.bf16.mxu0 %v1213_v10  ;;  %v574_v10 = vld [vmem:[#allocation2 + $0x2a0] sm:$0xff]  ;;  %v457_v38 = vld [vmem:[%s1848_s25 + $0xf8] sm:$0xff]  ;;  %v456_v40 = vld [vmem:[%s1848_s25 + $0xf0] sm:$0xff] }
  0xe4   : > { %v1171_v17 = vpack.c.bf16 %v574_v10, %v570_v9  ;;  %v454_v39 = vld [vmem:[%s1848_s25 + $0xe0] sm:$0xff]  ;;  %v467_v49 = vld [vmem:[%s1848_s25 + $0x148] sm:$0xff]  ;;  %v469_v50 = vld [vmem:[%s1848_s25 + $0x158] sm:$0xff] }
  0xe5   : > { %v466_v51 = vld [vmem:[%s1848_s25 + $0x140] sm:$0xff]  ;;  %v468_v52 = vld [vmem:[%s1848_s25 + $0x150] sm:$0xff]  ;;  %v479_v61 = vld [vmem:[%s1848_s25 + $0x1a8] sm:$0xff] }
  0xe6   : > { %v481_v62 = vld [vmem:[%s1848_s25 + $0x1b8] sm:$0xff]  ;;  %v478_v63 = vld [vmem:[%s1848_s25 + $0x1a0] sm:$0xff]  ;;  %v480_v0 = vld [vmem:[%s1848_s25 + $0x1b0] sm:$0xff] }
  0xe9   : > { %1152 = vmatpush1.bf16.xpose.msra.mxu1 %v1151_v19  ;;  %v1173_v19 = vpack.c.bf16 %v583_v14, %v579_v13  ;;  %v431_v13 = vld [vmem:[%s1848_s25 + $0x28] sm:$0xff]  ;;  %v433_v14 = vld [vmem:[%s1848_s25 + $0x38] sm:$0xff] }
  0xea   : > { %1216 = vmatpush1.bf16.xpose.msra.mxu0 %v1215_v20  ;;  %1154 = vmatprep.subr.bf16.mxu1 %v1153_v21  ;;  %v1237_v20 = vpack.c.bf16 %v585_v16, %v581_v15  ;;  %v578_v21 = vld [vmem:[#allocation2 + $0x2c0] sm:$0xff]  ;;  %v432_v16 = vld [vmem:[%s1848_s25 + $0x30] sm:$0xff] }
  0xeb   : > { %1218 = vmatprep.subr.bf16.mxu0 %v1217_v22  ;;  %v582_v22 = vld [vmem:[#allocation2 + $0x2e0] sm:$0xff] }
  0xec   : > { %v1175_v29 = vpack.c.bf16 %v582_v22, %v578_v21  ;;  %v430_v15 = vld [vmem:[%s1848_s25 + $0x20] sm:$0xff]  ;;  %v439_v21 = vld [vmem:[%s1848_s25 + $0x68] sm:$0xff]  ;;  %v441_v22 = vld [vmem:[%s1848_s25 + $0x78] sm:$0xff] }
  0xf1   : > { %1156 = vmatpush1.bf16.xpose.msra.mxu1 %v1155_v33  ;;  %v586_v33 = vld [vmem:[#allocation2 + $0x300] sm:$0xff] }
  0xf2   : > { %1220 = vmatpush1.bf16.xpose.msra.mxu0 %v1219_v34  ;;  %1158 = vmatprep.subr.bf16.mxu1 %v1157_v35  ;;  %v590_v34 = vld [vmem:[#allocation2 + $0x320] sm:$0xff]  ;;  %v588_v35 = vld [vmem:[#allocation2 + $0x310] sm:$0xff] }
  0xf3   : > { %1222 = vmatprep.subr.bf16.mxu0 %v1221_v36  ;;  %v592_v36 = vld [vmem:[#allocation2 + $0x330] sm:$0xff]  ;;  %v1179_v41 = vpack.c.bf16 %v590_v34, %v586_v33  ;;  %v451_v33 = vld [vmem:[%s1848_s25 + $0xc8] sm:$0xff]  ;;  %v453_v34 = vld [vmem:[%s1848_s25 + $0xd8] sm:$0xff] }
  0xf4   : > { %v1243_v42 = vpack.c.bf16 %v592_v36, %v588_v35  ;;  %v450_v35 = vld [vmem:[%s1848_s25 + $0xc0] sm:$0xff]  ;;  %v452_v36 = vld [vmem:[%s1848_s25 + $0xd0] sm:$0xff] }
  0xf9   : > { %1160 = vmatpush1.bf16.xpose.msra.mxu1 %v1159_v45  ;;  %v594_v45 = vld [vmem:[#allocation2 + $0x340] sm:$0xff] }
  0xfa   : > { %1224 = vmatpush1.bf16.xpose.msra.mxu0 %v1223_v46  ;;  %1162 = vmatprep.subr.bf16.mxu1 %v1161_v47  ;;  %v598_v46 = vld [vmem:[#allocation2 + $0x360] sm:$0xff]  ;;  %v596_v47 = vld [vmem:[#allocation2 + $0x350] sm:$0xff] }
  0xfb   : > { %1226 = vmatprep.subr.bf16.mxu0 %v1225_v48  ;;  %v600_v48 = vld [vmem:[#allocation2 + $0x370] sm:$0xff]  ;;  %v1183_v53 = vpack.c.bf16 %v598_v46, %v594_v45  ;;  %v463_v45 = vld [vmem:[%s1848_s25 + $0x128] sm:$0xff]  ;;  %v465_v46 = vld [vmem:[%s1848_s25 + $0x138] sm:$0xff] }
  0xfc   : > { %v1247_v54 = vpack.c.bf16 %v600_v48, %v596_v47  ;;  %v462_v47 = vld [vmem:[%s1848_s25 + $0x120] sm:$0xff]  ;;  %v464_v48 = vld [vmem:[%s1848_s25 + $0x130] sm:$0xff] }
 0x101   : > { %1164 = vmatpush1.bf16.xpose.msra.mxu1 %v1163_v57  ;;  %v602_v57 = vld [vmem:[#allocation2 + $0x380] sm:$0xff] }
 0x102   : > { %1228 = vmatpush1.bf16.xpose.msra.mxu0 %v1227_v58  ;;  %1166 = vmatprep.subr.bf16.mxu1 %v1165_v59  ;;  %v606_v58 = vld [vmem:[#allocation2 + $0x3a0] sm:$0xff]  ;;  %v604_v59 = vld [vmem:[#allocation2 + $0x390] sm:$0xff] }
 0x103   : > { %1230 = vmatprep.subr.bf16.mxu0 %v1229_v60  ;;  %v608_v60 = vld [vmem:[#allocation2 + $0x3b0] sm:$0xff]  ;;  %v1187_v1 = vpack.c.bf16 %v606_v58, %v602_v57  ;;  %v475_v57 = vld [vmem:[%s1848_s25 + $0x188] sm:$0xff]  ;;  %v477_v58 = vld [vmem:[%s1848_s25 + $0x198] sm:$0xff] }
 0x104   : > { %v1251_v2 = vpack.c.bf16 %v608_v60, %v604_v59  ;;  %v474_v59 = vld [vmem:[%s1848_s25 + $0x180] sm:$0xff]  ;;  %v476_v60 = vld [vmem:[%s1848_s25 + $0x190] sm:$0xff] }
 0x109   : > { %1168 = vmatpush1.bf16.xpose.msra.mxu1 %v1167_v5  ;;  %v610_v5 = vld [vmem:[#allocation2 + $0x3c0] sm:$0xff] }
 0x10a   : > { %1232 = vmatpush1.bf16.xpose.msra.mxu0 %v1231_v6  ;;  %1170 = vmatprep.subr.bf16.mxu1 %v1169_v7  ;;  %v614_v6 = vld [vmem:[#allocation2 + $0x3e0] sm:$0xff]  ;;  %v612_v7 = vld [vmem:[#allocation2 + $0x3d0] sm:$0xff] }
 0x10b   : > { %1234 = vmatprep.subr.bf16.mxu0 %v1233_v8  ;;  %v616_v8 = vld [vmem:[#allocation2 + $0x3f0] sm:$0xff]  ;;  %v1191_v9 = vpack.c.bf16 %v614_v6, %v610_v5  ;;  %v487_v5 = vld [vmem:[%s1848_s25 + $0x1e8] sm:$0xff]  ;;  %v489_v6 = vld [vmem:[%s1848_s25 + $0x1f8] sm:$0xff] }
 0x10c   : > { %v1255_v10 = vpack.c.bf16 %v616_v8, %v612_v7  ;;  %v486_v7 = vld [vmem:[%s1848_s25 + $0x1e0] sm:$0xff]  ;;  %v488_v8 = vld [vmem:[%s1848_s25 + $0x1f0] sm:$0xff] }
 0x111   : > { %1172 = vmatpush1.bf16.xpose.msra.mxu1 %v1171_v17  ;;  %v435_v17 = vld [vmem:[%s1848_s25 + $0x48] sm:$0xff] }
 0x112   : > { %1236 = vmatpush1.bf16.xpose.msra.mxu0 %v1235_v18  ;;  %1174 = vmatprep.subr.bf16.mxu1 %v1173_v19  ;;  %v437_v18 = vld [vmem:[%s1848_s25 + $0x58] sm:$0xff]  ;;  %v434_v19 = vld [vmem:[%s1848_s25 + $0x40] sm:$0xff] }
 0x113   : > { %1238 = vmatprep.subr.bf16.mxu0 %v1237_v20  ;;  %v436_v20 = vld [vmem:[%s1848_s25 + $0x50] sm:$0xff] }
 0x119   : > { %1176 = vmatpush1.bf16.xpose.msra.mxu1 %v1175_v29  ;;  %v447_v29 = vld [vmem:[%s1848_s25 + $0xa8] sm:$0xff] }
 0x11a   : > { %1240 = vmatpush1.bf16.xpose.msra.mxu0 %v1239_v30  ;;  %1178 = vmatprep.subr.bf16.mxu1 %v1177_v31  ;;  %v449_v30 = vld [vmem:[%s1848_s25 + $0xb8] sm:$0xff]  ;;  %v446_v31 = vld [vmem:[%s1848_s25 + $0xa0] sm:$0xff] }
 0x11b   : > { %1242 = vmatprep.subr.bf16.mxu0 %v1241_v32  ;;  %v448_v32 = vld [vmem:[%s1848_s25 + $0xb0] sm:$0xff] }
 0x121   : > { %1180 = vmatpush1.bf16.xpose.msra.mxu1 %v1179_v41  ;;  %v459_v41 = vld [vmem:[%s1848_s25 + $0x108] sm:$0xff] }
 0x122   : > { %1244 = vmatpush1.bf16.xpose.msra.mxu0 %v1243_v42  ;;  %1182 = vmatprep.subr.bf16.mxu1 %v1181_v43  ;;  %v461_v42 = vld [vmem:[%s1848_s25 + $0x118] sm:$0xff]  ;;  %v458_v43 = vld [vmem:[%s1848_s25 + $0x100] sm:$0xff] }
 0x123   : > { %1246 = vmatprep.subr.bf16.mxu0 %v1245_v44  ;;  %v460_v44 = vld [vmem:[%s1848_s25 + $0x110] sm:$0xff] }
 0x129   : > { %1184 = vmatpush1.bf16.xpose.msra.mxu1 %v1183_v53  ;;  %v471_v53 = vld [vmem:[%s1848_s25 + $0x168] sm:$0xff] }
 0x12a   : > { %1248 = vmatpush1.bf16.xpose.msra.mxu0 %v1247_v54  ;;  %1186 = vmatprep.subr.bf16.mxu1 %v1185_v55  ;;  %v473_v54 = vld [vmem:[%s1848_s25 + $0x178] sm:$0xff]  ;;  %v470_v55 = vld [vmem:[%s1848_s25 + $0x160] sm:$0xff] }
 0x12b   : > { %1250 = vmatprep.subr.bf16.mxu0 %v1249_v56  ;;  %v472_v56 = vld [vmem:[%s1848_s25 + $0x170] sm:$0xff] }
 0x131   : > { %1188 = vmatpush1.bf16.xpose.msra.mxu1 %v1187_v1  ;;  %v483_v1 = vld [vmem:[%s1848_s25 + $0x1c8] sm:$0xff] }
 0x132   : > { %1252 = vmatpush1.bf16.xpose.msra.mxu0 %v1251_v2  ;;  %1190 = vmatprep.subr.bf16.mxu1 %v1189_v3  ;;  %v485_v2 = vld [vmem:[%s1848_s25 + $0x1d8] sm:$0xff]  ;;  %v482_v3 = vld [vmem:[%s1848_s25 + $0x1c0] sm:$0xff] }
 0x133   : > { %1254 = vmatprep.subr.bf16.mxu0 %v1253_v4  ;;  %v484_v4 = vld [vmem:[%s1848_s25 + $0x1d0] sm:$0xff]  ;;  %s1463_s25 = scalar_lea.vmem %s2147_s16, 4096 }
 0x134   : > { %p1464_p12 = scmp.ne.s32.totalorder %s2147_s16, %s1463_s25  ;;  %p1471_p1 = scmp.lt.s32.totalorder %s1469_s8, %s1463_s25 }
 0x136   : > { %p1465_p5 = pnand %p1464_p12, %p2245_p8  ;;  %p1472_p6 = por %p1471_p1, %p1470_p4 }
 0x138   : > { %p1466_p10 = pneg %p1465_p5 }
 0x139   : > { %1192 = vmatpush1.bf16.xpose.msra.mxu1 %v1191_v9 }
 0x13a   : > { %1256 = vmatpush1.bf16.xpose.msra.mxu0 %v1255_v10  ;;  %p1473_p2 = pnand %p1472_p6, %p1466_p10 }
 0x140   : > { %683 = vmatmul.mubr.f32.vlgmr.msra.gmra.mrb[0].mxu1 %v426_v11 }
 0x141   : > { %844 = vmatmul.mubr.f32.vlgmr.msra.gmra.mrb[0].mxu0 %v428_v12  ;;  %688 = vmatprep.mubr.f32.mxu1 %v431_v13 }
 0x142   : > { %849 = vmatprep.mubr.f32.mxu0 %v433_v14 }
 0x144   : > { %689 = vmatmul.mubr.f32.gmra.mrb[2].mxu1 %v430_v15 }
 0x145   : > { %850 = vmatmul.mubr.f32.gmra.mrb[2].mxu0 %v432_v16  ;;  %694 = vmatprep.mubr.f32.mxu1 %v435_v17 }
 0x146   : > { %855 = vmatprep.mubr.f32.mxu0 %v437_v18 }
 0x148   : > { %695 = vmatmul.mubr.f32.gmra.mrb[4].mxu1 %v434_v19 }
 0x149   : > { %856 = vmatmul.mubr.f32.gmra.mrb[4].mxu0 %v436_v20  ;;  %700 = vmatprep.mubr.f32.mxu1 %v439_v21 }
 0x14a   : > { %861 = vmatprep.mubr.f32.mxu0 %v441_v22 }
 0x14c   : > { %701 = vmatmul.mubr.f32.gmra.mrb[6].mxu1 %v438_v23 }
 0x14d   : > { %862 = vmatmul.mubr.f32.gmra.mrb[6].mxu0 %v440_v24  ;;  %706 = vmatprep.mubr.f32.mxu1 %v443_v25 }
 0x14e   : > { %867 = vmatprep.mubr.f32.mxu0 %v445_v26 }
 0x150   : > { %707 = vmatmul.mubr.f32.gmra.mrb[8].mxu1 %v442_v27 }
 0x151   : > { %868 = vmatmul.mubr.f32.gmra.mrb[8].mxu0 %v444_v28  ;;  %712 = vmatprep.mubr.f32.mxu1 %v447_v29 }
 0x152   : > { %873 = vmatprep.mubr.f32.mxu0 %v449_v30 }
 0x154   : > { %713 = vmatmul.mubr.f32.gmra.mrb[10].mxu1 %v446_v31 }
 0x155   : > { %874 = vmatmul.mubr.f32.gmra.mrb[10].mxu0 %v448_v32  ;;  %718 = vmatprep.mubr.f32.mxu1 %v451_v33 }
 0x156   : > { %879 = vmatprep.mubr.f32.mxu0 %v453_v34 }
 0x158   : > { %719 = vmatmul.mubr.f32.gmra.mrb[12].mxu1 %v450_v35 }
 0x159   : > { %880 = vmatmul.mubr.f32.gmra.mrb[12].mxu0 %v452_v36  ;;  %724 = vmatprep.mubr.f32.mxu1 %v455_v37 }
 0x15a   : > { %885 = vmatprep.mubr.f32.mxu0 %v457_v38 }
 0x15c   : > { %725 = vmatmul.mubr.f32.gmra.mrb[14].mxu1 %v454_v39 }
 0x15d   : > { %886 = vmatmul.mubr.f32.gmra.mrb[14].mxu0 %v456_v40  ;;  %730 = vmatprep.mubr.f32.mxu1 %v459_v41 }
 0x15e   : > { %891 = vmatprep.mubr.f32.mxu0 %v461_v42 }
 0x160   : > { %731 = vmatmul.mubr.f32.gmra.mrb[16].mxu1 %v458_v43 }
 0x161   : > { %892 = vmatmul.mubr.f32.gmra.mrb[16].mxu0 %v460_v44  ;;  %736 = vmatprep.mubr.f32.mxu1 %v463_v45 }
 0x162   : > { %897 = vmatprep.mubr.f32.mxu0 %v465_v46 }
 0x164   : > { %737 = vmatmul.mubr.f32.gmra.mrb[18].mxu1 %v462_v47 }
 0x165   : > { %898 = vmatmul.mubr.f32.gmra.mrb[18].mxu0 %v464_v48  ;;  %742 = vmatprep.mubr.f32.mxu1 %v467_v49 }
 0x166   : > { %903 = vmatprep.mubr.f32.mxu0 %v469_v50 }
 0x168   : > { %743 = vmatmul.mubr.f32.gmra.mrb[20].mxu1 %v466_v51 }
 0x169   : > { %904 = vmatmul.mubr.f32.gmra.mrb[20].mxu0 %v468_v52  ;;  %748 = vmatprep.mubr.f32.mxu1 %v471_v53 }
 0x16a   : > { %909 = vmatprep.mubr.f32.mxu0 %v473_v54 }
 0x16c   : > { %749 = vmatmul.mubr.f32.gmra.mrb[22].mxu1 %v470_v55 }
 0x16d   : > { %910 = vmatmul.mubr.f32.gmra.mrb[22].mxu0 %v472_v56  ;;  %754 = vmatprep.mubr.f32.mxu1 %v475_v57 }
 0x16e   : > { %915 = vmatprep.mubr.f32.mxu0 %v477_v58 }
 0x170   : > { %755 = vmatmul.mubr.f32.gmra.mrb[24].mxu1 %v474_v59 }
 0x171   : > { %916 = vmatmul.mubr.f32.gmra.mrb[24].mxu0 %v476_v60  ;;  %760 = vmatprep.mubr.f32.mxu1 %v479_v61 }
 0x172   : > { %921 = vmatprep.mubr.f32.mxu0 %v481_v62 }
 0x174   : > { %761 = vmatmul.mubr.f32.gmra.mrb[26].mxu1 %v478_v63 }
 0x175   : > { %922 = vmatmul.mubr.f32.gmra.mrb[26].mxu0 %v480_v0  ;;  %766 = vmatprep.mubr.f32.mxu1 %v483_v1 }
 0x176   : > { %927 = vmatprep.mubr.f32.mxu0 %v485_v2 }
 0x178   : > { %767 = vmatmul.mubr.f32.gmra.mrb[28].mxu1 %v482_v3 }
 0x179   : > { %928 = vmatmul.mubr.f32.gmra.mrb[28].mxu0 %v484_v4  ;;  %772 = vmatprep.mubr.f32.mxu1 %v487_v5 }
 0x17a   : > { %933 = vmatprep.mubr.f32.mxu0 %v489_v6 }
 0x17c   : > { %773 = vmatmul.mubr.f32.gmra.mrb[30].mxu1 %v486_v7 }
 0x17d   : > { %934 = vmatmul.mubr.f32.gmra.mrb[30].mxu0 %v488_v8 }
 0x213   : > { %v684_v9 = vpop.f32.mrb[0].mxu1 }
 0x214   : > { %v845_v10 = vpop.f32.mrb[0].mxu0  ;;  %v686_v11 = vpop.f32.mrb[1].mxu1 }
 0x215   : > { %v846_v12 = vadd.f32 %v845_v10, %v684_v9  ;;  %v847_v13 = vpop.f32.mrb[1].mxu0 }
 0x216   : > { %v848_v14 = vadd.f32 %v847_v13, %v686_v11 }
 0x217   : > { %940 = vst [vmem:[%s1862_s20] sm:$0xff] %v846_v12  ;;  %v690_v15 = vpop.f32.mrb[2].mxu1 }
 0x218   : > { %941 = vst [vmem:[%s1862_s20 + $0x8] sm:$0xff] %v848_v14  ;;  %v851_v16 = vpop.f32.mrb[2].mxu0  ;;  %v692_v17 = vpop.f32.mrb[3].mxu1 }
 0x219   : > { %v852_v18 = vadd.f32 %v851_v16, %v690_v15  ;;  %v853_v19 = vpop.f32.mrb[3].mxu0 }
 0x21a   : > { %v854_v20 = vadd.f32 %v853_v19, %v692_v17 }
 0x21b   : > { %942 = vst [vmem:[%s1862_s20 + $0x10] sm:$0xff] %v852_v18  ;;  %v696_v21 = vpop.f32.mrb[4].mxu1 }
 0x21c   : > { %943 = vst [vmem:[%s1862_s20 + $0x18] sm:$0xff] %v854_v20  ;;  %v857_v22 = vpop.f32.mrb[4].mxu0  ;;  %v698_v23 = vpop.f32.mrb[5].mxu1 }
 0x21d   : > { %v858_v24 = vadd.f32 %v857_v22, %v696_v21  ;;  %v859_v25 = vpop.f32.mrb[5].mxu0 }
 0x21e   : > { %v860_v26 = vadd.f32 %v859_v25, %v698_v23 }
 0x21f   : > { %944 = vst [vmem:[%s1862_s20 + $0x20] sm:$0xff] %v858_v24  ;;  %v702_v27 = vpop.f32.mrb[6].mxu1 }
 0x220   : > { %945 = vst [vmem:[%s1862_s20 + $0x28] sm:$0xff] %v860_v26  ;;  %v863_v28 = vpop.f32.mrb[6].mxu0  ;;  %v704_v29 = vpop.f32.mrb[7].mxu1 }
 0x221   : > { %v864_v30 = vadd.f32 %v863_v28, %v702_v27  ;;  %v865_v31 = vpop.f32.mrb[7].mxu0 }
 0x222   : > { %v866_v32 = vadd.f32 %v865_v31, %v704_v29 }
 0x223   : > { %946 = vst [vmem:[%s1862_s20 + $0x30] sm:$0xff] %v864_v30  ;;  %v708_v33 = vpop.f32.mrb[8].mxu1 }
 0x224   : > { %947 = vst [vmem:[%s1862_s20 + $0x38] sm:$0xff] %v866_v32  ;;  %v869_v34 = vpop.f32.mrb[8].mxu0  ;;  %v710_v35 = vpop.f32.mrb[9].mxu1 }
 0x225   : > { %v870_v36 = vadd.f32 %v869_v34, %v708_v33  ;;  %v871_v37 = vpop.f32.mrb[9].mxu0 }
 0x226   : > { %v872_v38 = vadd.f32 %v871_v37, %v710_v35 }
 0x227   : > { %948 = vst [vmem:[%s1862_s20 + $0x40] sm:$0xff] %v870_v36  ;;  %v714_v39 = vpop.f32.mrb[10].mxu1 }
 0x228   : > { %949 = vst [vmem:[%s1862_s20 + $0x48] sm:$0xff] %v872_v38  ;;  %v875_v40 = vpop.f32.mrb[10].mxu0  ;;  %v716_v41 = vpop.f32.mrb[11].mxu1 }
 0x229   : > { %v876_v42 = vadd.f32 %v875_v40, %v714_v39  ;;  %v877_v43 = vpop.f32.mrb[11].mxu0 }
 0x22a   : > { %v878_v44 = vadd.f32 %v877_v43, %v716_v41 }
 0x22b   : > { %950 = vst [vmem:[%s1862_s20 + $0x50] sm:$0xff] %v876_v42  ;;  %v720_v45 = vpop.f32.mrb[12].mxu1 }
 0x22c   : > { %951 = vst [vmem:[%s1862_s20 + $0x58] sm:$0xff] %v878_v44  ;;  %v881_v46 = vpop.f32.mrb[12].mxu0  ;;  %v722_v47 = vpop.f32.mrb[13].mxu1 }
 0x22d   : > { %v882_v48 = vadd.f32 %v881_v46, %v720_v45  ;;  %v883_v49 = vpop.f32.mrb[13].mxu0 }
 0x22e   : > { %v884_v50 = vadd.f32 %v883_v49, %v722_v47 }
 0x22f   : > { %952 = vst [vmem:[%s1862_s20 + $0x60] sm:$0xff] %v882_v48  ;;  %v726_v51 = vpop.f32.mrb[14].mxu1 }
 0x230   : > { %953 = vst [vmem:[%s1862_s20 + $0x68] sm:$0xff] %v884_v50  ;;  %v887_v52 = vpop.f32.mrb[14].mxu0  ;;  %v728_v53 = vpop.f32.mrb[15].mxu1 }
 0x231   : > { %v888_v54 = vadd.f32 %v887_v52, %v726_v51  ;;  %v889_v55 = vpop.f32.mrb[15].mxu0 }
 0x232   : > { %v890_v56 = vadd.f32 %v889_v55, %v728_v53 }
 0x233   : > { %954 = vst [vmem:[%s1862_s20 + $0x70] sm:$0xff] %v888_v54  ;;  %v732_v57 = vpop.f32.mrb[16].mxu1 }
 0x234   : > { %955 = vst [vmem:[%s1862_s20 + $0x78] sm:$0xff] %v890_v56  ;;  %v893_v58 = vpop.f32.mrb[16].mxu0  ;;  %v734_v59 = vpop.f32.mrb[17].mxu1 }
 0x235   : > { %v894_v60 = vadd.f32 %v893_v58, %v732_v57  ;;  %v895_v61 = vpop.f32.mrb[17].mxu0 }
 0x236   : > { %v896_v62 = vadd.f32 %v895_v61, %v734_v59 }
 0x237   : > { %956 = vst [vmem:[%s1862_s20 + $0x80] sm:$0xff] %v894_v60  ;;  %v738_v63 = vpop.f32.mrb[18].mxu1 }
 0x238   : > { %957 = vst [vmem:[%s1862_s20 + $0x88] sm:$0xff] %v896_v62  ;;  %v899_v0 = vpop.f32.mrb[18].mxu0  ;;  %v740_v1 = vpop.f32.mrb[19].mxu1 }
 0x239   : > { %v900_v2 = vadd.f32 %v899_v0, %v738_v63  ;;  %v901_v3 = vpop.f32.mrb[19].mxu0 }
 0x23a   : > { %v902_v4 = vadd.f32 %v901_v3, %v740_v1 }
 0x23b   : > { %958 = vst [vmem:[%s1862_s20 + $0x90] sm:$0xff] %v900_v2  ;;  %v744_v5 = vpop.f32.mrb[20].mxu1 }
 0x23c   : > { %959 = vst [vmem:[%s1862_s20 + $0x98] sm:$0xff] %v902_v4  ;;  %v905_v6 = vpop.f32.mrb[20].mxu0  ;;  %v746_v7 = vpop.f32.mrb[21].mxu1 }
 0x23d   : > { %v906_v8 = vadd.f32 %v905_v6, %v744_v5  ;;  %v907_v9 = vpop.f32.mrb[21].mxu0 }
 0x23e   : > { %v908_v10 = vadd.f32 %v907_v9, %v746_v7 }
 0x23f   : > { %960 = vst [vmem:[%s1862_s20 + $0xa0] sm:$0xff] %v906_v8  ;;  %v750_v11 = vpop.f32.mrb[22].mxu1 }
 0x240   : > { %961 = vst [vmem:[%s1862_s20 + $0xa8] sm:$0xff] %v908_v10  ;;  %v911_v12 = vpop.f32.mrb[22].mxu0  ;;  %v752_v13 = vpop.f32.mrb[23].mxu1 }
 0x241   : > { %v912_v14 = vadd.f32 %v911_v12, %v750_v11  ;;  %v913_v15 = vpop.f32.mrb[23].mxu0 }
 0x242   : > { %v914_v16 = vadd.f32 %v913_v15, %v752_v13 }
 0x243   : > { %962 = vst [vmem:[%s1862_s20 + $0xb0] sm:$0xff] %v912_v14  ;;  %v756_v17 = vpop.f32.mrb[24].mxu1 }
 0x244   : > { %963 = vst [vmem:[%s1862_s20 + $0xb8] sm:$0xff] %v914_v16  ;;  %v917_v18 = vpop.f32.mrb[24].mxu0  ;;  %v758_v19 = vpop.f32.mrb[25].mxu1 }
 0x245   : > { %v918_v20 = vadd.f32 %v917_v18, %v756_v17  ;;  %v919_v21 = vpop.f32.mrb[25].mxu0 }
 0x246   : > { %v920_v22 = vadd.f32 %v919_v21, %v758_v19 }
 0x247   : > { %964 = vst [vmem:[%s1862_s20 + $0xc0] sm:$0xff] %v918_v20  ;;  %v762_v23 = vpop.f32.mrb[26].mxu1 }
 0x248   : > { %965 = vst [vmem:[%s1862_s20 + $0xc8] sm:$0xff] %v920_v22  ;;  %v923_v24 = vpop.f32.mrb[26].mxu0  ;;  %v764_v25 = vpop.f32.mrb[27].mxu1 }
 0x249   : > { %v924_v26 = vadd.f32 %v923_v24, %v762_v23  ;;  %v925_v27 = vpop.f32.mrb[27].mxu0 }
 0x24a   : > { %v926_v28 = vadd.f32 %v925_v27, %v764_v25 }
 0x24b   : > { %966 = vst [vmem:[%s1862_s20 + $0xd0] sm:$0xff] %v924_v26  ;;  %v768_v29 = vpop.f32.mrb[28].mxu1 }
 0x24c   : > { %967 = vst [vmem:[%s1862_s20 + $0xd8] sm:$0xff] %v926_v28  ;;  %v929_v30 = vpop.f32.mrb[28].mxu0  ;;  %v770_v31 = vpop.f32.mrb[29].mxu1 }
 0x24d   : > { %v930_v32 = vadd.f32 %v929_v30, %v768_v29  ;;  %v931_v33 = vpop.f32.mrb[29].mxu0 }
 0x24e   : > { %v932_v34 = vadd.f32 %v931_v33, %v770_v31 }
 0x24f   : > { %968 = vst [vmem:[%s1862_s20 + $0xe0] sm:$0xff] %v930_v32  ;;  %v774_v35 = vpop.f32.mrb[30].mxu1 }
 0x250   : > { %969 = vst [vmem:[%s1862_s20 + $0xe8] sm:$0xff] %v932_v34  ;;  %v935_v36 = vpop.f32.mrb[30].mxu0  ;;  %v776_v37 = vpop.f32.mrb[31].mxu1 }
 0x251   : > { %v936_v38 = vadd.f32 %v935_v36, %v774_v35  ;;  %v937_v39 = vpop.f32.mrb[31].mxu0 }
 0x252   : > { %v938_v40 = vadd.f32 %v937_v39, %v776_v37 }
 0x253   : > { %970 = vst [vmem:[%s1862_s20 + $0xf0] sm:$0xff] %v936_v38 }
 0x254   : > { %971 = vst [vmem:[%s1862_s20 + $0xf8] sm:$0xff] %v938_v40 }
 0x255   : > { %1476 = shalt.err (!%p1473_p2)
}
 0x256   : > { %s1477_s2 = scalar_lea.hbm %s2145_s9, 4096  ;;  %s1481_s28 = scalar_lea.hbm %s2244_s24, 32768 }
 0x257   : > { %p1478_p9 = scmp.ne.s32.totalorder %s2145_s9, %s1477_s2  ;;  %p1482_p7 = scmp.lt.u32.totalorder %s2145_s9, %s2244_s24 }
 0x258   : > { %p1483_p11 = scmp.lt.u32.totalorder %s1481_s28, %s1477_s2  ;;  %p1485_p12 = scmp.lt.u32.totalorder %s1477_s2, %s2145_s9 }
 0x259   : > { %p1479_p13 = pnand %p1478_p9, %p2245_p8 }
 0x25a   : > { %p1484_p3 = por %p1483_p11, %p1482_p7 }
 0x25b   : > { %p1480_p0 = pneg %p1479_p13 }
 0x25c   : > { %p1486_p5 = por %p1485_p12, %p1484_p3 }
 0x25e   : > { %p1487_p10 = pnand %p1486_p5, %p1480_p0 }
 0x260   : > { %1490 = shalt.err (!%p1487_p10)
}
 0x261   : > { %s1598_s15 = smov 256   ;;  %s1599_s3 = smov 1024  }
 0x262   : > { %s1600_s23 = smov 16  }
 0x263   : > { %1293 = dma.vmem_to_hbm [thread:$0]  (%p2245_p8), %s2147_s16, 4096, %s2145_s9, %s973_s21, %s1598_s15, %s1599_s3, %s1600_s23  }
 0x264 PF: > { %s2246_s25 = sld [smem:[#allocation12_spill]]  ;;  %p1307_p4 = scmp.ge.s32.totalorder %s1589_s19, 2 }
 0x265   : > { %p2247_p1 = scmp.ne.s32.totalorder %s2233_s4, 0 }
 0x267   : > { %p1303_p6 = pnand %p1307_p4, %p2247_p1 }
 0x26a   : > { %s1004_s26 = sand.u32 1, %s2246_s25  }
 0x26b   : > { %s1005_s7 = scalar_lea.sflag [#allocation5], %s1004_s26 }
 0x26c   : > { %1544 = dma.done.wait (!%p1303_p6), %s1005_s7, 4096  }
 0x26d   : > { %1546 = vsyncadd (!%p1303_p6), %s1005_s7, 4294963200  ;;  %s21_s19 = sadd.s32 1, %s1589_s19   ;;  %s2248_s29 = sld [smem:[#allocation13_spill]] }
 0x26e   : > { %p18_p2 = scmp.ge.s32.totalorder %s21_s19, 10   ;;  %s2249_s22 = sld [smem:[#allocation14_spill]] }
 0x26f   : > { %s2250_s9 = smov %s1553_s10  ;;  %s2251_s10 = smov %s1557_s11 }
 0x270   : > { %s2252_s11 = smov %s1781_s6  ;;  %s2253_s12 = smov %s1565_s13 }
 0x271   : > { %s2254_s13 = smov %s1569_s14  ;;  %s2255_s14 = smov %s1720_s5 }
 0x272   : > { %s2256_s15 = smov %s1581_s17  ;;  %s2257_s16 = smov %s1585_s18 }
 0x273   : > { %s2258_s17 = smov %s2248_s29  ;;  %20 = sbr.rel (!%p18_p2) target bundleno = 13 (0xd), region = 90 }
 0x274   : > { %s2259_s18 = smov %s2249_s22 }
 0x27a   :  { %1010 = vsyncpa [#allocation4], 1 }
 0x27b   :  { %1012 = vsyncpa [#allocation4 + $0x1], 1 }
 0x27c   :  { %1013 = vsyncpa [#allocation7], 1 }
 0x27d   :  { %1015 = vsyncpa [#allocation7 + $0x1], 1 }
 0x27e   :  { %1016 = vsyncpa [#allocation5], 1 }
 0x27f   :  { %1018 = vsyncpa [#allocation5 + $0x1], 1 }

</bundles_post_ra>
